<compile_context>
chip_gen: v7x
topology: tpu7x:2x2x1
jax: 0.10.0
libtpu: 0.0.40
codegen_flags: <defaults>
</compile_context>

<pallas_src>
import functools

import jax
import jax.numpy as jnp
from jax import lax
from jax.experimental import pallas as pl
from jax.experimental.pallas import tpu as pltpu

LN_EPS = 1e-5
NEG_INF = -1e9  # CLIP fills the causal mask with -inf; -1e9 is equivalent post-softmax.


def _layernorm(x, w, b):
    mu = jnp.mean(x, axis=-1, keepdims=True)
    var = jnp.mean((x - mu) ** 2, axis=-1, keepdims=True)
    return (x - mu) * lax.rsqrt(var + LN_EPS) * w + b


# -----------------------------------------------------------------------------
# Pallas kernel: one CLIP ResidualAttentionBlock (LN1 -> causal MHA -> residual
# -> LN2 -> MLP(QuickGELU) -> residual).  BM batch rows per grid step.
# -----------------------------------------------------------------------------
def block_kernel(x_ref, ln1w_ref, ln1b_ref, wqkv_ref, bqkv_ref, wo_ref, bo_ref,
                 ln2w_ref, ln2b_ref, w1_ref, b1_ref, w2_ref, b2_ref,
                 out_ref, *, num_heads):
    BM, S, D = x_ref.shape
    H = num_heads
    dh = D // H
    scale = dh ** -0.5
    N = BM * S

    # flatten batch rows so every dense matmul sees N = BM*S rows on the MXU
    x = x_ref[...].astype(jnp.float32).reshape(N, D)

    # causal mask built in-kernel (VPU iota + compare; no (S,S) DMA per block)
    row = lax.broadcasted_iota(jnp.int32, (S, S), 0)
    col = lax.broadcasted_iota(jnp.int32, (S, S), 1)
    mask = jnp.where(col > row, jnp.float32(NEG_INF), jnp.float32(0.0))

    # ---- multi-head self attention (causal) ----
    xn = _layernorm(x, ln1w_ref[...], ln1b_ref[...])
    qkv = jnp.dot(xn.astype(jnp.bfloat16), wqkv_ref[...],
                  preferred_element_type=jnp.float32) + bqkv_ref[...]       # (N, 3D) f32
    qkv3 = qkv.reshape(BM, S, 3 * D)

    attn_acc = jnp.zeros((N, D), jnp.float32)
    for h in range(H):
        qh = qkv3[:, :, h * dh:(h + 1) * dh] * scale                        # (BM,S,dh)
        kh = qkv3[:, :, D + h * dh:D + (h + 1) * dh]
        vh = qkv3[:, :, 2 * D + h * dh:2 * D + (h + 1) * dh]
        s = jnp.einsum('bqd,bkd->bqk',
                       qh.astype(jnp.bfloat16), kh.astype(jnp.bfloat16),
                       preferred_element_type=jnp.float32)                  # (BM,S,S)
        s = s + mask[None]
        s = s - jnp.max(s, axis=-1, keepdims=True)
        p = jnp.exp(s)
        p = p * pl.reciprocal(jnp.sum(p, axis=-1, keepdims=True), approx=True)
        ctx = jnp.einsum('bqk,bkd->bqd',
                         p.astype(jnp.bfloat16), vh.astype(jnp.bfloat16),
                         preferred_element_type=jnp.float32)                # (BM,S,dh)
        # out-projection contribution of this head == einsum('hsd,hde->se');
        # avoids concatenating head outputs (no cross-lane concat shuffle).
        attn_acc = attn_acc + jnp.dot(
            ctx.reshape(N, dh).astype(jnp.bfloat16),
            wo_ref[h * dh:(h + 1) * dh, :],
            preferred_element_type=jnp.float32)
    x = x + attn_acc + bo_ref[...]

    # ---- MLP with QuickGELU ----
    xn2 = _layernorm(x, ln2w_ref[...], ln2b_ref[...])
    h1 = jnp.dot(xn2.astype(jnp.bfloat16), w1_ref[...],
                 preferred_element_type=jnp.float32) + b1_ref[...]
    h1 = h1 * jax.nn.sigmoid(1.702 * h1)             # QuickGELU
    h2 = jnp.dot(h1.astype(jnp.bfloat16), w2_ref[...],
                 preferred_element_type=jnp.float32) + b2_ref[...]
    x = x + h2

    out_ref[...] = x.reshape(BM, S, D).astype(out_ref.dtype)


def run_block(x, p, *, num_heads, block_batch):
    B, S, D = x.shape
    BM = block_batch
    assert B % BM == 0, "block_batch must divide batch"

    def rep(shape):
        return pl.BlockSpec(shape, lambda b: (0,) * len(shape))

    kernel = functools.partial(block_kernel, num_heads=num_heads)
    return pl.pallas_call(
        kernel,
        out_shape=jax.ShapeDtypeStruct((B, S, D), x.dtype),
        grid=(B // BM,),
        in_specs=[
            pl.BlockSpec((BM, S, D), lambda b: (b, 0, 0)),
            rep((1, D)), rep((1, D)),                 # ln_1 (f32)
            rep((D, 3 * D)), rep((1, 3 * D)),         # in-proj qkv (bf16 w, f32 b)
            rep((D, D)), rep((1, D)),                 # out-proj
            rep((1, D)), rep((1, D)),                 # ln_2
            rep((D, 4 * D)), rep((1, 4 * D)),         # mlp c_fc
            rep((4 * D, D)), rep((1, D)),             # mlp c_proj
        ],
        out_specs=pl.BlockSpec((BM, S, D), lambda b: (b, 0, 0)),
        # update the activation buffer in place -> no fresh (B,S,D) HBM output
        # per layer.
        input_output_aliases={0: 0},
        compiler_params=pltpu.CompilerParams(
            dimension_semantics=("parallel",),        # megacore / v7x dual-TC
            vmem_limit_bytes=48 * 1024 * 1024,        # budgeted for v7x 64 MiB VMEM
        ),
    )(x, p["ln1_w"], p["ln1_b"], p["wqkv"], p["bqkv"], p["wo"], p["bo"],
      p["ln2_w"], p["ln2_b"], p["w1"], p["b1"], p["w2"], p["b2"])


# -----------------------------------------------------------------------------
# Pallas kernel: ln_final on the EOT tokens + text_projection matmul.
# -----------------------------------------------------------------------------
def head_kernel(x_ref, lnw_ref, lnb_ref, proj_ref, out_ref):
    x = x_ref[...].astype(jnp.float32)               # (B, D)
    xn = _layernorm(x, lnw_ref[...], lnb_ref[...])
    out_ref[...] = jnp.dot(xn.astype(jnp.bfloat16), proj_ref[...],
                           preferred_element_type=jnp.float32).astype(out_ref.dtype)


def run_head(x_eot, ln_w, ln_b, proj):
    B, _ = x_eot.shape
    E = proj.shape[1]
    return pl.pallas_call(
        head_kernel,
        out_shape=jax.ShapeDtypeStruct((B, E), x_eot.dtype),
    )(x_eot, ln_w, ln_b, proj)


# -----------------------------------------------------------------------------
# TextEncoder.forward equivalent.
# -----------------------------------------------------------------------------
def text_encoder_forward(params, prompts, tokenized_prompts,
                         compound_prompts_deeper_text, *, num_heads, n_ctx,
                         block_batch=None):
    # x = prompts + positional_embedding
    x = prompts + params["positional_embedding"][None]          # (B, S, D)
    B, S, D = x.shape

    if block_batch is None:
        # largest divisor of B (<= 8 rows/step) that keeps >= 2 grid steps so
        # both v7x TensorCores stay busy; fall back to the largest divisor.
        divs = [d for d in range(1, min(B, 8) + 1) if B % d == 0]
        pref = [d for d in divs if B // d >= 2]
        block_batch = max(pref) if pref else max(divs)

    # transformer([x, compound_prompts_deeper_text, 0]) -- MaPLe text branch:
    # layers > 0 replace tokens [1 : 1+n_ctx) with the deeper compound prompt.
    counter = 0
    for i, blk in enumerate(params["blocks"]):
        if i > 0 and counter < len(compound_prompts_deeper_text):
            ctx = compound_prompts_deeper_text[counter]          # (n_ctx, D)
            ctx_b = jnp.broadcast_to(ctx[None], (B,) + ctx.shape).astype(x.dtype)
            x = lax.dynamic_update_slice(x, ctx_b, (0, 1, 0))    # in-place-style overwrite
            counter += 1
        x = run_block(x, blk, num_heads=num_heads, block_batch=block_batch)

    # gather the EOT token (argmax over token ids), then ln_final + projection
    eot = jnp.argmax(tokenized_prompts, axis=-1)                 # (B,)
    x_eot = jnp.take_along_axis(x, eot[:, None, None], axis=1)[:, 0, :]   # (B, D)
    return run_head(x_eot, params["ln_final_w"], params["ln_final_b"],
                    params["text_projection"])


# -----------------------------------------------------------------------------
# Deterministic synthetic parameters (matmul weights stored in bf16).
# -----------------------------------------------------------------------------
def init_params(key, n_layers, S, D, E):
    def nrm(k, shape, scale=0.02, dtype=jnp.float32):
        return (scale * jax.random.normal(k, shape)).astype(dtype)

    keys = iter(jax.random.split(key, 4 + 8 * n_layers))
    params = {
        "positional_embedding": nrm(next(keys), (S, D)),
        "ln_final_w": 1.0 + nrm(next(keys), (1, D)),
        "ln_final_b": nrm(next(keys), (1, D)),
        "text_projection": nrm(next(keys), (D, E), scale=D ** -0.5,
                               dtype=jnp.bfloat16),
        "blocks": [],
    }
    for _ in range(n_layers):
        params["blocks"].append({
            "ln1_w": 1.0 + nrm(next(keys), (1, D)),
            "ln1_b": nrm(next(keys), (1, D)),
            "wqkv": nrm(next(keys), (D, 3 * D), dtype=jnp.bfloat16),
            "bqkv": jnp.zeros((1, 3 * D), jnp.float32),
            "wo": nrm(next(keys), (D, D), dtype=jnp.bfloat16),
            "bo": jnp.zeros((1, D), jnp.float32),
            "ln2_w": 1.0 + nrm(next(keys), (1, D)),
            "ln2_b": nrm(next(keys), (1, D)),
            "w1": nrm(next(keys), (D, 4 * D), dtype=jnp.bfloat16),
            "b1": jnp.zeros((1, 4 * D), jnp.float32),
            "w2": nrm(next(keys), (4 * D, D), dtype=jnp.bfloat16),
            "b2": jnp.zeros((1, D), jnp.float32),
        })
    return params


if __name__ == "__main__":
    B, S, D, E = 4, 8, 32, 32          # batch, seq, width, projection dim
    num_heads, n_layers, n_ctx = 4, 2, 2

    key = jax.random.PRNGKey(0)
    k_par, k_prompt, k_tok, k_ctx = jax.random.split(key, 4)

    params = init_params(k_par, n_layers, S, D, E)

    prompts = (0.02 * jax.random.normal(k_prompt, (B, S, D))).astype(jnp.float32)
    tokenized_prompts = jax.random.randint(k_tok, (B, S), 1, 1000, dtype=jnp.int32)
    # make sure each row has a unique max (EOT position), like a real token seq
    for r, pos in enumerate((5, 6, 4, 7)):
        tokenized_prompts = tokenized_prompts.at[r, pos].set(49407)
    compound_prompts_deeper_text = [
        (0.02 * jax.random.normal(k_ctx, (n_ctx, D))).astype(jnp.float32)
    ]

    out = text_encoder_forward(params, prompts, tokenized_prompts,
                               compound_prompts_deeper_text,
                               num_heads=num_heads, n_ctx=n_ctx)
    out = jax.block_until_ready(out)
    assert out.shape == (B, E) and jnp.all(jnp.isfinite(out))
    print("KERNEL_OK")
</pallas_src>

<mosaic_0001>
module attributes {stable_mosaic.version = 11 : i64} {
  func.func @block_kernel(%arg0: i32, %arg1: memref<2x8x32xf32, #tpu.memory_space<vmem>>, %arg2: memref<1x32xf32, #tpu.memory_space<vmem>>, %arg3: memref<1x32xf32, #tpu.memory_space<vmem>>, %arg4: memref<32x96xbf16, #tpu.memory_space<vmem>>, %arg5: memref<1x96xf32, #tpu.memory_space<vmem>>, %arg6: memref<32x32xbf16, #tpu.memory_space<vmem>>, %arg7: memref<1x32xf32, #tpu.memory_space<vmem>>, %arg8: memref<1x32xf32, #tpu.memory_space<vmem>>, %arg9: memref<1x32xf32, #tpu.memory_space<vmem>>, %arg10: memref<32x128xbf16, #tpu.memory_space<vmem>>, %arg11: memref<1x128xf32, #tpu.memory_space<vmem>>, %arg12: memref<128x32xbf16, #tpu.memory_space<vmem>>, %arg13: memref<1x32xf32, #tpu.memory_space<vmem>>, %arg14: memref<2x8x32xf32, #tpu.memory_space<vmem>>) attributes {dimension_semantics = [#tpu.dimension_semantics<parallel>], iteration_bounds = array<i64: 2>, scalar_prefetch = 0 : i64, scratch_operands = 0 : i64, tpu.core_type = #tpu.core_type<tc>, window_params = [{transform_indices = @transform_0, window_bounds = array<i64: 2, 8, 32>}, {pipeline_mode = #tpu.pipeline_mode<synchronous>, transform_indices = @transform_1, window_bounds = array<i64: 1, 32>}, {pipeline_mode = #tpu.pipeline_mode<synchronous>, transform_indices = @transform_2, window_bounds = array<i64: 1, 32>}, {pipeline_mode = #tpu.pipeline_mode<synchronous>, transform_indices = @transform_3, window_bounds = array<i64: 32, 96>}, {pipeline_mode = #tpu.pipeline_mode<synchronous>, transform_indices = @transform_4, window_bounds = array<i64: 1, 96>}, {pipeline_mode = #tpu.pipeline_mode<synchronous>, transform_indices = @transform_5, window_bounds = array<i64: 32, 32>}, {pipeline_mode = #tpu.pipeline_mode<synchronous>, transform_indices = @transform_6, window_bounds = array<i64: 1, 32>}, {pipeline_mode = #tpu.pipeline_mode<synchronous>, transform_indices = @transform_7, window_bounds = array<i64: 1, 32>}, {pipeline_mode = #tpu.pipeline_mode<synchronous>, transform_indices = @transform_8, window_bounds = array<i64: 1, 32>}, {pipeline_mode = #tpu.pipeline_mode<synchronous>, transform_indices = @transform_9, window_bounds = array<i64: 32, 128>}, {pipeline_mode = #tpu.pipeline_mode<synchronous>, transform_indices = @transform_10, window_bounds = array<i64: 1, 128>}, {pipeline_mode = #tpu.pipeline_mode<synchronous>, transform_indices = @transform_11, window_bounds = array<i64: 128, 32>}, {pipeline_mode = #tpu.pipeline_mode<synchronous>, transform_indices = @transform_12, window_bounds = array<i64: 1, 32>}, {transform_indices = @transform_13, window_bounds = array<i64: 2, 8, 32>}]} {
    %c0 = arith.constant 0 : index
    %c0_0 = arith.constant 0 : index
    %c0_1 = arith.constant 0 : index
    %0 = vector.load %arg1[%c0, %c0_0, %c0_1] : memref<2x8x32xf32, #tpu.memory_space<vmem>>, vector<2x8x32xf32>
    %1 = vector.shape_cast %0 : vector<2x8x32xf32> to vector<16x32xf32>
    %2 = tpu.iota {dimensions = array<i32: 0>} : vector<8x8xi32>
    %3 = tpu.iota {dimensions = array<i32: 1>} : vector<8x8xi32>
    %4 = arith.cmpi sgt, %3, %2 : vector<8x8xi32>
    %cst = arith.constant -1.000000e+09 : f32
    %cst_2 = arith.constant 0.000000e+00 : f32
    %5 = vector.broadcast %cst : f32 to vector<8x8xf32>
    %6 = vector.broadcast %cst_2 : f32 to vector<8x8xf32>
    %7 = arith.select %4, %5, %6 : vector<8x8xi1>, vector<8x8xf32>
    %c0_3 = arith.constant 0 : index
    %c0_4 = arith.constant 0 : index
    %8 = vector.load %arg2[%c0_3, %c0_4] : memref<1x32xf32, #tpu.memory_space<vmem>>, vector<1x32xf32>
    %c0_5 = arith.constant 0 : index
    %c0_6 = arith.constant 0 : index
    %9 = vector.load %arg3[%c0_5, %c0_6] : memref<1x32xf32, #tpu.memory_space<vmem>>, vector<1x32xf32>
    %cst_7 = arith.constant dense<0.000000e+00> : vector<16xf32>
    %10 = vector.multi_reduction <add>, %1, %cst_7 [1] : vector<16x32xf32> to vector<16xf32>
    %11 = vector.shape_cast %10 : vector<16xf32> to vector<16x1xf32>
    %cst_8 = arith.constant 3.200000e+01 : f32
    %12 = vector.broadcast %cst_8 : f32 to vector<16x1xf32>
    %13 = arith.divf %11, %12 : vector<16x1xf32>
    %14 = vector.broadcast %13 : vector<16x1xf32> to vector<16x32xf32>
    %15 = arith.subf %1, %14 : vector<16x32xf32>
    %16 = arith.mulf %15, %15 : vector<16x32xf32>
    %cst_9 = arith.constant dense<0.000000e+00> : vector<16xf32>
    %17 = vector.multi_reduction <add>, %16, %cst_9 [1] : vector<16x32xf32> to vector<16xf32>
    %18 = vector.shape_cast %17 : vector<16xf32> to vector<16x1xf32>
    %cst_10 = arith.constant 3.200000e+01 : f32
    %19 = vector.broadcast %cst_10 : f32 to vector<16x1xf32>
    %20 = arith.divf %18, %19 : vector<16x1xf32>
    %21 = vector.broadcast %13 : vector<16x1xf32> to vector<16x32xf32>
    %22 = arith.subf %1, %21 : vector<16x32xf32>
    %cst_11 = arith.constant 9.99999974E-6 : f32
    %23 = vector.broadcast %cst_11 : f32 to vector<16x1xf32>
    %24 = arith.addf %20, %23 : vector<16x1xf32>
    %25 = math.rsqrt %24 : vector<16x1xf32>
    %26 = vector.broadcast %25 : vector<16x1xf32> to vector<16x32xf32>
    %27 = arith.mulf %22, %26 : vector<16x32xf32>
    %28 = vector.broadcast %8 : vector<1x32xf32> to vector<16x32xf32>
    %29 = arith.mulf %27, %28 : vector<16x32xf32>
    %30 = vector.broadcast %9 : vector<1x32xf32> to vector<16x32xf32>
    %31 = arith.addf %29, %30 : vector<16x32xf32>
    %32 = arith.truncf %31 : vector<16x32xf32> to vector<16x32xbf16>
    %c0_12 = arith.constant 0 : index
    %c0_13 = arith.constant 0 : index
    %33 = vector.load %arg4[%c0_12, %c0_13] : memref<32x96xbf16, #tpu.memory_space<vmem>>, vector<32x96xbf16>
    %cst_14 = arith.constant dense<0.000000e+00> : vector<16x96xf32>
    %34 = tpu.matmul %32, %33, %cst_14 {dimension_numbers = #tpu.dot_dimension_numbers<[1], [0], [0], [1], [0, 0, 1, 1], [], []>} : vector<16x32xbf16>, vector<32x96xbf16>, vector<16x96xf32> -> vector<16x96xf32>
    %c0_15 = arith.constant 0 : index
    %c0_16 = arith.constant 0 : index
    %35 = vector.load %arg5[%c0_15, %c0_16] : memref<1x96xf32, #tpu.memory_space<vmem>>, vector<1x96xf32>
    %36 = vector.broadcast %35 : vector<1x96xf32> to vector<16x96xf32>
    %37 = arith.addf %34, %36 : vector<16x96xf32>
    %38 = vector.shape_cast %37 : vector<16x96xf32> to vector<2x8x96xf32>
    %cst_17 = arith.constant 0.000000e+00 : f32
    %39 = vector.broadcast %cst_17 : f32 to vector<16x32xf32>
    %40 = vector.extract_strided_slice %38 {offsets = [0, 0, 0], sizes = [2, 8, 8], strides = [1, 1, 1]} : vector<2x8x96xf32> to vector<2x8x8xf32>
    %cst_18 = arith.constant 0.353553385 : f32
    %41 = vector.broadcast %cst_18 : f32 to vector<2x8x8xf32>
    %42 = arith.mulf %40, %41 : vector<2x8x8xf32>
    %43 = vector.extract_strided_slice %38 {offsets = [0, 0, 32], sizes = [2, 8, 8], strides = [1, 1, 1]} : vector<2x8x96xf32> to vector<2x8x8xf32>
    %44 = vector.extract_strided_slice %38 {offsets = [0, 0, 64], sizes = [2, 8, 8], strides = [1, 1, 1]} : vector<2x8x96xf32> to vector<2x8x8xf32>
    %45 = arith.truncf %42 : vector<2x8x8xf32> to vector<2x8x8xbf16>
    %46 = arith.truncf %43 : vector<2x8x8xf32> to vector<2x8x8xbf16>
    "tpu.trace_start"() <{level = 10 : i32, message = "bqd,bkd->bqk"}> : () -> ()
    %cst_19 = arith.constant dense<0.000000e+00> : vector<2x8x8xf32>
    %47 = tpu.matmul %45, %46, %cst_19 {dimension_numbers = #tpu.dot_dimension_numbers<[2], [2], [1], [1], [0, 0, 0, 1, 1, 1], [0], [0]>} : vector<2x8x8xbf16>, vector<2x8x8xbf16>, vector<2x8x8xf32> -> vector<2x8x8xf32>
    "tpu.trace_stop"() : () -> ()
    %48 = vector.shape_cast %7 : vector<8x8xf32> to vector<1x8x8xf32>
    %49 = vector.broadcast %48 : vector<1x8x8xf32> to vector<2x8x8xf32>
    %50 = arith.addf %47, %49 : vector<2x8x8xf32>
    %cst_20 = arith.constant dense<0xFF800000> : vector<2x8xf32>
    %51 = vector.multi_reduction <maximumf>, %50, %cst_20 [2] : vector<2x8x8xf32> to vector<2x8xf32>
    %52 = vector.shape_cast %51 : vector<2x8xf32> to vector<2x8x1xf32>
    %53 = vector.broadcast %52 : vector<2x8x1xf32> to vector<2x8x8xf32>
    %54 = arith.subf %50, %53 : vector<2x8x8xf32>
    %55 = math.exp %54 : vector<2x8x8xf32>
    %cst_21 = arith.constant dense<0.000000e+00> : vector<2x8xf32>
    %56 = vector.multi_reduction <add>, %55, %cst_21 [2] : vector<2x8x8xf32> to vector<2x8xf32>
    %57 = vector.shape_cast %56 : vector<2x8xf32> to vector<2x8x1xf32>
    %58 = tpu.reciprocal %57 {approx = true} : vector<2x8x1xf32> -> vector<2x8x1xf32>
    %59 = vector.broadcast %58 : vector<2x8x1xf32> to vector<2x8x8xf32>
    %60 = arith.mulf %55, %59 : vector<2x8x8xf32>
    %61 = arith.truncf %60 : vector<2x8x8xf32> to vector<2x8x8xbf16>
    %62 = arith.truncf %44 : vector<2x8x8xf32> to vector<2x8x8xbf16>
    "tpu.trace_start"() <{level = 10 : i32, message = "bqk,bkd->bqd"}> : () -> ()
    %cst_22 = arith.constant dense<0.000000e+00> : vector<2x8x8xf32>
    %63 = tpu.matmul %61, %62, %cst_22 {dimension_numbers = #tpu.dot_dimension_numbers<[2], [1], [1], [2], [0, 0, 0, 1, 1, 2], [0], [0]>} : vector<2x8x8xbf16>, vector<2x8x8xbf16>, vector<2x8x8xf32> -> vector<2x8x8xf32>
    "tpu.trace_stop"() : () -> ()
    %64 = vector.shape_cast %63 : vector<2x8x8xf32> to vector<16x8xf32>
    %65 = arith.truncf %64 : vector<16x8xf32> to vector<16x8xbf16>
    %c0_23 = arith.constant 0 : index
    %c0_24 = arith.constant 0 : index
    %66 = vector.load %arg6[%c0_23, %c0_24] : memref<32x32xbf16, #tpu.memory_space<vmem>>, vector<8x32xbf16>
    %cst_25 = arith.constant dense<0.000000e+00> : vector<16x32xf32>
    %67 = tpu.matmul %65, %66, %cst_25 {dimension_numbers = #tpu.dot_dimension_numbers<[1], [0], [0], [1], [0, 0, 1, 1], [], []>} : vector<16x8xbf16>, vector<8x32xbf16>, vector<16x32xf32> -> vector<16x32xf32>
    %68 = arith.addf %39, %67 : vector<16x32xf32>
    %69 = vector.extract_strided_slice %38 {offsets = [0, 0, 8], sizes = [2, 8, 8], strides = [1, 1, 1]} : vector<2x8x96xf32> to vector<2x8x8xf32>
    %cst_26 = arith.constant 0.353553385 : f32
    %70 = vector.broadcast %cst_26 : f32 to vector<2x8x8xf32>
    %71 = arith.mulf %69, %70 : vector<2x8x8xf32>
    %72 = vector.extract_strided_slice %38 {offsets = [0, 0, 40], sizes = [2, 8, 8], strides = [1, 1, 1]} : vector<2x8x96xf32> to vector<2x8x8xf32>
    %73 = vector.extract_strided_slice %38 {offsets = [0, 0, 72], sizes = [2, 8, 8], strides = [1, 1, 1]} : vector<2x8x96xf32> to vector<2x8x8xf32>
    %74 = arith.truncf %71 : vector<2x8x8xf32> to vector<2x8x8xbf16>
    %75 = arith.truncf %72 : vector<2x8x8xf32> to vector<2x8x8xbf16>
    "tpu.trace_start"() <{level = 10 : i32, message = "bqd,bkd->bqk"}> : () -> ()
    %cst_27 = arith.constant dense<0.000000e+00> : vector<2x8x8xf32>
    %76 = tpu.matmul %74, %75, %cst_27 {dimension_numbers = #tpu.dot_dimension_numbers<[2], [2], [1], [1], [0, 0, 0, 1, 1, 1], [0], [0]>} : vector<2x8x8xbf16>, vector<2x8x8xbf16>, vector<2x8x8xf32> -> vector<2x8x8xf32>
    "tpu.trace_stop"() : () -> ()
    %77 = vector.shape_cast %7 : vector<8x8xf32> to vector<1x8x8xf32>
    %78 = vector.broadcast %77 : vector<1x8x8xf32> to vector<2x8x8xf32>
    %79 = arith.addf %76, %78 : vector<2x8x8xf32>
    %cst_28 = arith.constant dense<0xFF800000> : vector<2x8xf32>
    %80 = vector.multi_reduction <maximumf>, %79, %cst_28 [2] : vector<2x8x8xf32> to vector<2x8xf32>
    %81 = vector.shape_cast %80 : vector<2x8xf32> to vector<2x8x1xf32>
    %82 = vector.broadcast %81 : vector<2x8x1xf32> to vector<2x8x8xf32>
    %83 = arith.subf %79, %82 : vector<2x8x8xf32>
    %84 = math.exp %83 : vector<2x8x8xf32>
    %cst_29 = arith.constant dense<0.000000e+00> : vector<2x8xf32>
    %85 = vector.multi_reduction <add>, %84, %cst_29 [2] : vector<2x8x8xf32> to vector<2x8xf32>
    %86 = vector.shape_cast %85 : vector<2x8xf32> to vector<2x8x1xf32>
    %87 = tpu.reciprocal %86 {approx = true} : vector<2x8x1xf32> -> vector<2x8x1xf32>
    %88 = vector.broadcast %87 : vector<2x8x1xf32> to vector<2x8x8xf32>
    %89 = arith.mulf %84, %88 : vector<2x8x8xf32>
    %90 = arith.truncf %89 : vector<2x8x8xf32> to vector<2x8x8xbf16>
    %91 = arith.truncf %73 : vector<2x8x8xf32> to vector<2x8x8xbf16>
    "tpu.trace_start"() <{level = 10 : i32, message = "bqk,bkd->bqd"}> : () -> ()
    %cst_30 = arith.constant dense<0.000000e+00> : vector<2x8x8xf32>
    %92 = tpu.matmul %90, %91, %cst_30 {dimension_numbers = #tpu.dot_dimension_numbers<[2], [1], [1], [2], [0, 0, 0, 1, 1, 2], [0], [0]>} : vector<2x8x8xbf16>, vector<2x8x8xbf16>, vector<2x8x8xf32> -> vector<2x8x8xf32>
    "tpu.trace_stop"() : () -> ()
    %93 = vector.shape_cast %92 : vector<2x8x8xf32> to vector<16x8xf32>
    %94 = arith.truncf %93 : vector<16x8xf32> to vector<16x8xbf16>
    %c8 = arith.constant 8 : index
    %c0_31 = arith.constant 0 : index
    %95 = vector.load %arg6[%c8, %c0_31] : memref<32x32xbf16, #tpu.memory_space<vmem>>, vector<8x32xbf16>
    %cst_32 = arith.constant dense<0.000000e+00> : vector<16x32xf32>
    %96 = tpu.matmul %94, %95, %cst_32 {dimension_numbers = #tpu.dot_dimension_numbers<[1], [0], [0], [1], [0, 0, 1, 1], [], []>} : vector<16x8xbf16>, vector<8x32xbf16>, vector<16x32xf32> -> vector<16x32xf32>
    %97 = arith.addf %68, %96 : vector<16x32xf32>
    %98 = vector.extract_strided_slice %38 {offsets = [0, 0, 16], sizes = [2, 8, 8], strides = [1, 1, 1]} : vector<2x8x96xf32> to vector<2x8x8xf32>
    %cst_33 = arith.constant 0.353553385 : f32
    %99 = vector.broadcast %cst_33 : f32 to vector<2x8x8xf32>
    %100 = arith.mulf %98, %99 : vector<2x8x8xf32>
    %101 = vector.extract_strided_slice %38 {offsets = [0, 0, 48], sizes = [2, 8, 8], strides = [1, 1, 1]} : vector<2x8x96xf32> to vector<2x8x8xf32>
    %102 = vector.extract_strided_slice %38 {offsets = [0, 0, 80], sizes = [2, 8, 8], strides = [1, 1, 1]} : vector<2x8x96xf32> to vector<2x8x8xf32>
    %103 = arith.truncf %100 : vector<2x8x8xf32> to vector<2x8x8xbf16>
    %104 = arith.truncf %101 : vector<2x8x8xf32> to vector<2x8x8xbf16>
    "tpu.trace_start"() <{level = 10 : i32, message = "bqd,bkd->bqk"}> : () -> ()
    %cst_34 = arith.constant dense<0.000000e+00> : vector<2x8x8xf32>
    %105 = tpu.matmul %103, %104, %cst_34 {dimension_numbers = #tpu.dot_dimension_numbers<[2], [2], [1], [1], [0, 0, 0, 1, 1, 1], [0], [0]>} : vector<2x8x8xbf16>, vector<2x8x8xbf16>, vector<2x8x8xf32> -> vector<2x8x8xf32>
    "tpu.trace_stop"() : () -> ()
    %106 = vector.shape_cast %7 : vector<8x8xf32> to vector<1x8x8xf32>
    %107 = vector.broadcast %106 : vector<1x8x8xf32> to vector<2x8x8xf32>
    %108 = arith.addf %105, %107 : vector<2x8x8xf32>
    %cst_35 = arith.constant dense<0xFF800000> : vector<2x8xf32>
    %109 = vector.multi_reduction <maximumf>, %108, %cst_35 [2] : vector<2x8x8xf32> to vector<2x8xf32>
    %110 = vector.shape_cast %109 : vector<2x8xf32> to vector<2x8x1xf32>
    %111 = vector.broadcast %110 : vector<2x8x1xf32> to vector<2x8x8xf32>
    %112 = arith.subf %108, %111 : vector<2x8x8xf32>
    %113 = math.exp %112 : vector<2x8x8xf32>
    %cst_36 = arith.constant dense<0.000000e+00> : vector<2x8xf32>
    %114 = vector.multi_reduction <add>, %113, %cst_36 [2] : vector<2x8x8xf32> to vector<2x8xf32>
    %115 = vector.shape_cast %114 : vector<2x8xf32> to vector<2x8x1xf32>
    %116 = tpu.reciprocal %115 {approx = true} : vector<2x8x1xf32> -> vector<2x8x1xf32>
    %117 = vector.broadcast %116 : vector<2x8x1xf32> to vector<2x8x8xf32>
    %118 = arith.mulf %113, %117 : vector<2x8x8xf32>
    %119 = arith.truncf %118 : vector<2x8x8xf32> to vector<2x8x8xbf16>
    %120 = arith.truncf %102 : vector<2x8x8xf32> to vector<2x8x8xbf16>
    "tpu.trace_start"() <{level = 10 : i32, message = "bqk,bkd->bqd"}> : () -> ()
    %cst_37 = arith.constant dense<0.000000e+00> : vector<2x8x8xf32>
    %121 = tpu.matmul %119, %120, %cst_37 {dimension_numbers = #tpu.dot_dimension_numbers<[2], [1], [1], [2], [0, 0, 0, 1, 1, 2], [0], [0]>} : vector<2x8x8xbf16>, vector<2x8x8xbf16>, vector<2x8x8xf32> -> vector<2x8x8xf32>
    "tpu.trace_stop"() : () -> ()
    %122 = vector.shape_cast %121 : vector<2x8x8xf32> to vector<16x8xf32>
    %123 = arith.truncf %122 : vector<16x8xf32> to vector<16x8xbf16>
    %c16 = arith.constant 16 : index
    %c0_38 = arith.constant 0 : index
    %124 = vector.load %arg6[%c16, %c0_38] : memref<32x32xbf16, #tpu.memory_space<vmem>>, vector<8x32xbf16>
    %cst_39 = arith.constant dense<0.000000e+00> : vector<16x32xf32>
    %125 = tpu.matmul %123, %124, %cst_39 {dimension_numbers = #tpu.dot_dimension_numbers<[1], [0], [0], [1], [0, 0, 1, 1], [], []>} : vector<16x8xbf16>, vector<8x32xbf16>, vector<16x32xf32> -> vector<16x32xf32>
    %126 = arith.addf %97, %125 : vector<16x32xf32>
    %127 = vector.extract_strided_slice %38 {offsets = [0, 0, 24], sizes = [2, 8, 8], strides = [1, 1, 1]} : vector<2x8x96xf32> to vector<2x8x8xf32>
    %cst_40 = arith.constant 0.353553385 : f32
    %128 = vector.broadcast %cst_40 : f32 to vector<2x8x8xf32>
    %129 = arith.mulf %127, %128 : vector<2x8x8xf32>
    %130 = vector.extract_strided_slice %38 {offsets = [0, 0, 56], sizes = [2, 8, 8], strides = [1, 1, 1]} : vector<2x8x96xf32> to vector<2x8x8xf32>
    %131 = vector.extract_strided_slice %38 {offsets = [0, 0, 88], sizes = [2, 8, 8], strides = [1, 1, 1]} : vector<2x8x96xf32> to vector<2x8x8xf32>
    %132 = arith.truncf %129 : vector<2x8x8xf32> to vector<2x8x8xbf16>
    %133 = arith.truncf %130 : vector<2x8x8xf32> to vector<2x8x8xbf16>
    "tpu.trace_start"() <{level = 10 : i32, message = "bqd,bkd->bqk"}> : () -> ()
    %cst_41 = arith.constant dense<0.000000e+00> : vector<2x8x8xf32>
    %134 = tpu.matmul %132, %133, %cst_41 {dimension_numbers = #tpu.dot_dimension_numbers<[2], [2], [1], [1], [0, 0, 0, 1, 1, 1], [0], [0]>} : vector<2x8x8xbf16>, vector<2x8x8xbf16>, vector<2x8x8xf32> -> vector<2x8x8xf32>
    "tpu.trace_stop"() : () -> ()
    %135 = vector.shape_cast %7 : vector<8x8xf32> to vector<1x8x8xf32>
    %136 = vector.broadcast %135 : vector<1x8x8xf32> to vector<2x8x8xf32>
    %137 = arith.addf %134, %136 : vector<2x8x8xf32>
    %cst_42 = arith.constant dense<0xFF800000> : vector<2x8xf32>
    %138 = vector.multi_reduction <maximumf>, %137, %cst_42 [2] : vector<2x8x8xf32> to vector<2x8xf32>
    %139 = vector.shape_cast %138 : vector<2x8xf32> to vector<2x8x1xf32>
    %140 = vector.broadcast %139 : vector<2x8x1xf32> to vector<2x8x8xf32>
    %141 = arith.subf %137, %140 : vector<2x8x8xf32>
    %142 = math.exp %141 : vector<2x8x8xf32>
    %cst_43 = arith.constant dense<0.000000e+00> : vector<2x8xf32>
    %143 = vector.multi_reduction <add>, %142, %cst_43 [2] : vector<2x8x8xf32> to vector<2x8xf32>
    %144 = vector.shape_cast %143 : vector<2x8xf32> to vector<2x8x1xf32>
    %145 = tpu.reciprocal %144 {approx = true} : vector<2x8x1xf32> -> vector<2x8x1xf32>
    %146 = vector.broadcast %145 : vector<2x8x1xf32> to vector<2x8x8xf32>
    %147 = arith.mulf %142, %146 : vector<2x8x8xf32>
    %148 = arith.truncf %147 : vector<2x8x8xf32> to vector<2x8x8xbf16>
    %149 = arith.truncf %131 : vector<2x8x8xf32> to vector<2x8x8xbf16>
    "tpu.trace_start"() <{level = 10 : i32, message = "bqk,bkd->bqd"}> : () -> ()
    %cst_44 = arith.constant dense<0.000000e+00> : vector<2x8x8xf32>
    %150 = tpu.matmul %148, %149, %cst_44 {dimension_numbers = #tpu.dot_dimension_numbers<[2], [1], [1], [2], [0, 0, 0, 1, 1, 2], [0], [0]>} : vector<2x8x8xbf16>, vector<2x8x8xbf16>, vector<2x8x8xf32> -> vector<2x8x8xf32>
    "tpu.trace_stop"() : () -> ()
    %151 = vector.shape_cast %150 : vector<2x8x8xf32> to vector<16x8xf32>
    %152 = arith.truncf %151 : vector<16x8xf32> to vector<16x8xbf16>
    %c24 = arith.constant 24 : index
    %c0_45 = arith.constant 0 : index
    %153 = vector.load %arg6[%c24, %c0_45] : memref<32x32xbf16, #tpu.memory_space<vmem>>, vector<8x32xbf16>
    %cst_46 = arith.constant dense<0.000000e+00> : vector<16x32xf32>
    %154 = tpu.matmul %152, %153, %cst_46 {dimension_numbers = #tpu.dot_dimension_numbers<[1], [0], [0], [1], [0, 0, 1, 1], [], []>} : vector<16x8xbf16>, vector<8x32xbf16>, vector<16x32xf32> -> vector<16x32xf32>
    %155 = arith.addf %126, %154 : vector<16x32xf32>
    %156 = arith.addf %1, %155 : vector<16x32xf32>
    %c0_47 = arith.constant 0 : index
    %c0_48 = arith.constant 0 : index
    %157 = vector.load %arg7[%c0_47, %c0_48] : memref<1x32xf32, #tpu.memory_space<vmem>>, vector<1x32xf32>
    %158 = vector.broadcast %157 : vector<1x32xf32> to vector<16x32xf32>
    %159 = arith.addf %156, %158 : vector<16x32xf32>
    %c0_49 = arith.constant 0 : index
    %c0_50 = arith.constant 0 : index
    %160 = vector.load %arg8[%c0_49, %c0_50] : memref<1x32xf32, #tpu.memory_space<vmem>>, vector<1x32xf32>
    %c0_51 = arith.constant 0 : index
    %c0_52 = arith.constant 0 : index
    %161 = vector.load %arg9[%c0_51, %c0_52] : memref<1x32xf32, #tpu.memory_space<vmem>>, vector<1x32xf32>
    %cst_53 = arith.constant dense<0.000000e+00> : vector<16xf32>
    %162 = vector.multi_reduction <add>, %159, %cst_53 [1] : vector<16x32xf32> to vector<16xf32>
    %163 = vector.shape_cast %162 : vector<16xf32> to vector<16x1xf32>
    %cst_54 = arith.constant 3.200000e+01 : f32
    %164 = vector.broadcast %cst_54 : f32 to vector<16x1xf32>
    %165 = arith.divf %163, %164 : vector<16x1xf32>
    %166 = vector.broadcast %165 : vector<16x1xf32> to vector<16x32xf32>
    %167 = arith.subf %159, %166 : vector<16x32xf32>
    %168 = arith.mulf %167, %167 : vector<16x32xf32>
    %cst_55 = arith.constant dense<0.000000e+00> : vector<16xf32>
    %169 = vector.multi_reduction <add>, %168, %cst_55 [1] : vector<16x32xf32> to vector<16xf32>
    %170 = vector.shape_cast %169 : vector<16xf32> to vector<16x1xf32>
    %cst_56 = arith.constant 3.200000e+01 : f32
    %171 = vector.broadcast %cst_56 : f32 to vector<16x1xf32>
    %172 = arith.divf %170, %171 : vector<16x1xf32>
    %173 = vector.broadcast %165 : vector<16x1xf32> to vector<16x32xf32>
    %174 = arith.subf %159, %173 : vector<16x32xf32>
    %cst_57 = arith.constant 9.99999974E-6 : f32
    %175 = vector.broadcast %cst_57 : f32 to vector<16x1xf32>
    %176 = arith.addf %172, %175 : vector<16x1xf32>
    %177 = math.rsqrt %176 : vector<16x1xf32>
    %178 = vector.broadcast %177 : vector<16x1xf32> to vector<16x32xf32>
    %179 = arith.mulf %174, %178 : vector<16x32xf32>
    %180 = vector.broadcast %160 : vector<1x32xf32> to vector<16x32xf32>
    %181 = arith.mulf %179, %180 : vector<16x32xf32>
    %182 = vector.broadcast %161 : vector<1x32xf32> to vector<16x32xf32>
    %183 = arith.addf %181, %182 : vector<16x32xf32>
    %184 = arith.truncf %183 : vector<16x32xf32> to vector<16x32xbf16>
    %c0_58 = arith.constant 0 : index
    %c0_59 = arith.constant 0 : index
    %185 = vector.load %arg10[%c0_58, %c0_59] : memref<32x128xbf16, #tpu.memory_space<vmem>>, vector<32x128xbf16>
    %cst_60 = arith.constant dense<0.000000e+00> : vector<16x128xf32>
    %186 = tpu.matmul %184, %185, %cst_60 {dimension_numbers = #tpu.dot_dimension_numbers<[1], [0], [0], [1], [0, 0, 1, 1], [], []>} : vector<16x32xbf16>, vector<32x128xbf16>, vector<16x128xf32> -> vector<16x128xf32>
    %c0_61 = arith.constant 0 : index
    %c0_62 = arith.constant 0 : index
    %187 = vector.load %arg11[%c0_61, %c0_62] : memref<1x128xf32, #tpu.memory_space<vmem>>, vector<1x128xf32>
    %188 = vector.broadcast %187 : vector<1x128xf32> to vector<16x128xf32>
    %189 = arith.addf %186, %188 : vector<16x128xf32>
    %cst_63 = arith.constant 1.702000e+00 : f32
    %190 = vector.broadcast %cst_63 : f32 to vector<16x128xf32>
    %191 = arith.mulf %190, %189 : vector<16x128xf32>
    %192 = arith.negf %191 : vector<16x128xf32>
    %193 = math.exp %192 : vector<16x128xf32>
    %cst_64 = arith.constant 1.000000e+00 : f32
    %194 = vector.broadcast %cst_64 : f32 to vector<16x128xf32>
    %195 = arith.addf %194, %193 : vector<16x128xf32>
    %196 = arith.divf %194, %195 : vector<16x128xf32>
    %197 = arith.mulf %189, %196 : vector<16x128xf32>
    %198 = arith.truncf %197 : vector<16x128xf32> to vector<16x128xbf16>
    %c0_65 = arith.constant 0 : index
    %c0_66 = arith.constant 0 : index
    %199 = vector.load %arg12[%c0_65, %c0_66] : memref<128x32xbf16, #tpu.memory_space<vmem>>, vector<128x32xbf16>
    %cst_67 = arith.constant dense<0.000000e+00> : vector<16x32xf32>
    %200 = tpu.matmul %198, %199, %cst_67 {dimension_numbers = #tpu.dot_dimension_numbers<[1], [0], [0], [1], [0, 0, 1, 1], [], []>} : vector<16x128xbf16>, vector<128x32xbf16>, vector<16x32xf32> -> vector<16x32xf32>
    %c0_68 = arith.constant 0 : index
    %c0_69 = arith.constant 0 : index
    %201 = vector.load %arg13[%c0_68, %c0_69] : memref<1x32xf32, #tpu.memory_space<vmem>>, vector<1x32xf32>
    %202 = vector.broadcast %201 : vector<1x32xf32> to vector<16x32xf32>
    %203 = arith.addf %200, %202 : vector<16x32xf32>
    %204 = arith.addf %159, %203 : vector<16x32xf32>
    %205 = vector.shape_cast %204 : vector<16x32xf32> to vector<2x8x32xf32>
    %c0_70 = arith.constant 0 : index
    %c0_71 = arith.constant 0 : index
    %c0_72 = arith.constant 0 : index
    %206 = vector.load %arg14[%c0_70, %c0_71, %c0_72] : memref<2x8x32xf32, #tpu.memory_space<vmem>>, vector<2x8x32xf32>
    tpu.vector_store %arg14[%c0_70, %c0_71, %c0_72], %205 {strides = array<i32>} : memref<2x8x32xf32, #tpu.memory_space<vmem>>, vector<2x8x32xf32>,
    return
  }
  func.func @transform_0(%arg0: i32) -> (i32, i32, i32) {
    %c0_i32 = arith.constant 0 : i32
    %c0_i32_0 = arith.constant 0 : i32
    %c0_i32_1 = arith.constant 0 : i32
    return %arg0, %c0_i32, %c0_i32_0 : i32, i32, i32
  }
  func.func @transform_1(%arg0: i32) -> (i32, i32) {
    %c0_i32 = arith.constant 0 : i32
    %c0_i32_0 = arith.constant 0 : i32
    %c0_i32_1 = arith.constant 0 : i32
    return %c0_i32, %c0_i32_0 : i32, i32
  }
  func.func @transform_2(%arg0: i32) -> (i32, i32) {
    %c0_i32 = arith.constant 0 : i32
    %c0_i32_0 = arith.constant 0 : i32
    %c0_i32_1 = arith.constant 0 : i32
    return %c0_i32, %c0_i32_0 : i32, i32
  }
  func.func @transform_3(%arg0: i32) -> (i32, i32) {
    %c0_i32 = arith.constant 0 : i32
    %c0_i32_0 = arith.constant 0 : i32
    %c0_i32_1 = arith.constant 0 : i32
    return %c0_i32, %c0_i32_0 : i32, i32
  }
  func.func @transform_4(%arg0: i32) -> (i32, i32) {
    %c0_i32 = arith.constant 0 : i32
    %c0_i32_0 = arith.constant 0 : i32
    %c0_i32_1 = arith.constant 0 : i32
    return %c0_i32, %c0_i32_0 : i32, i32
  }
  func.func @transform_5(%arg0: i32) -> (i32, i32) {
    %c0_i32 = arith.constant 0 : i32
    %c0_i32_0 = arith.constant 0 : i32
    %c0_i32_1 = arith.constant 0 : i32
    return %c0_i32, %c0_i32_0 : i32, i32
  }
  func.func @transform_6(%arg0: i32) -> (i32, i32) {
    %c0_i32 = arith.constant 0 : i32
    %c0_i32_0 = arith.constant 0 : i32
    %c0_i32_1 = arith.constant 0 : i32
    return %c0_i32, %c0_i32_0 : i32, i32
  }
  func.func @transform_7(%arg0: i32) -> (i32, i32) {
    %c0_i32 = arith.constant 0 : i32
    %c0_i32_0 = arith.constant 0 : i32
    %c0_i32_1 = arith.constant 0 : i32
    return %c0_i32, %c0_i32_0 : i32, i32
  }
  func.func @transform_8(%arg0: i32) -> (i32, i32) {
    %c0_i32 = arith.constant 0 : i32
    %c0_i32_0 = arith.constant 0 : i32
    %c0_i32_1 = arith.constant 0 : i32
    return %c0_i32, %c0_i32_0 : i32, i32
  }
  func.func @transform_9(%arg0: i32) -> (i32, i32) {
    %c0_i32 = arith.constant 0 : i32
    %c0_i32_0 = arith.constant 0 : i32
    %c0_i32_1 = arith.constant 0 : i32
    return %c0_i32, %c0_i32_0 : i32, i32
  }
  func.func @transform_10(%arg0: i32) -> (i32, i32) {
    %c0_i32 = arith.constant 0 : i32
    %c0_i32_0 = arith.constant 0 : i32
    %c0_i32_1 = arith.constant 0 : i32
    return %c0_i32, %c0_i32_0 : i32, i32
  }
  func.func @transform_11(%arg0: i32) -> (i32, i32) {
    %c0_i32 = arith.constant 0 : i32
    %c0_i32_0 = arith.constant 0 : i32
    %c0_i32_1 = arith.constant 0 : i32
    return %c0_i32, %c0_i32_0 : i32, i32
  }
  func.func @transform_12(%arg0: i32) -> (i32, i32) {
    %c0_i32 = arith.constant 0 : i32
    %c0_i32_0 = arith.constant 0 : i32
    %c0_i32_1 = arith.constant 0 : i32
    return %c0_i32, %c0_i32_0 : i32, i32
  }
  func.func @transform_13(%arg0: i32) -> (i32, i32, i32) {
    %c0_i32 = arith.constant 0 : i32
    %c0_i32_0 = arith.constant 0 : i32
    %c0_i32_1 = arith.constant 0 : i32
    return %arg0, %c0_i32, %c0_i32_0 : i32, i32, i32
  }
}

</mosaic_0001>

<bundles_post_ra>
// kernel: tpu_custom_call.1
= control target key start
LH: loop header
LB: loop body
LE: loop exit
PB: predicated region body
PF: predicated region fallthrough
CT: control target
= control target key end

     0   :  { %18 = vsyncpa [#allocation3], 0  ;;  %s3062_s0 = inlined_call_operand.hbm [shape: f32[4,8,32], index: 0, kind: input, shape index: {}, may-alias: {0,13}]   ;;  %s3063_s1 = inlined_call_operand.vmem [shape: f32[1,32], index: 1, kind: input, shape index: {}]   ;;  %s3064_s2 = inlined_call_operand.vmem [shape: f32[1,32], index: 2, kind: input, shape index: {}]   ;;  %s3065_s3 = inlined_call_operand.vmem [shape: bf16[32,96], index: 3, kind: input, shape index: {}]   ;;  %s3066_s4 = inlined_call_operand.vmem [shape: f32[1,96], index: 4, kind: input, shape index: {}]   ;;  %s3067_s5 = inlined_call_operand.vmem [shape: bf16[32,32], index: 5, kind: input, shape index: {}]   ;;  %s3068_s6 = inlined_call_operand.vmem [shape: f32[1,32], index: 6, kind: input, shape index: {}]   ;;  %s3069_s7 = inlined_call_operand.vmem [shape: f32[1,32], index: 7, kind: input, shape index: {}]   ;;  %s3070_s8 = inlined_call_operand.vmem [shape: f32[1,32], index: 8, kind: input, shape index: {}]   ;;  %s3071_s9 = inlined_call_operand.vmem [shape: bf16[32,128], index: 9, kind: input, shape index: {}]   ;;  %s3072_s10 = inlined_call_operand.vmem [shape: f32[1,128], index: 10, kind: input, shape index: {}]   ;;  %s3073_s11 = inlined_call_operand.vmem [shape: bf16[128,32], index: 11, kind: input, shape index: {}]   ;;  %s3074_s12 = inlined_call_operand.vmem [shape: f32[1,32], index: 12, kind: input, shape index: {}]   ;;  %s3075_s13 = inlined_call_operand.hbm [shape: f32[4,8,32], index: 13, kind: output, shape index: {}, may-alias: {0,13}]  }
   0x1   :  { %20 = vsyncpa [#allocation3 + $0x1], 0 }
   0x2   :  { %21 = vsyncpa [#allocation4], 0 }
   0x3   :  { %23 = vsyncpa [#allocation4 + $0x1], 0  ;;  %s2596_s25 = smov 0   ;;  %s2598_s26 = smov 0  }
   0x4   :  { %s2600_s27 = smov 0   ;;  %s2602_s28 = smov 0  }
   0x5 LB: > { %3081 = sst [smem:[#allocation8_spill]] %s2493_s25  ;;  %s2617_s29 = sadd.s32 4294967295, %s2505_s28   ;;  %s2505_s28 = sphi %s2602_s28, %s3094_s28   ;;  %s2501_s27 = sphi %s2600_s27, %s3096_s27   ;;  %s2497_s26 = sphi %s2598_s26, %s3098_s26   ;;  %s2493_s25 = sphi %s2596_s25, %s3097_s25  }
   0x6   : > { %3082 = sst [smem:[#allocation9_spill]] %s2501_s27  ;;  %s2015_s30 = sadd.s32 4294967294, %s2505_s28  }
   0x7   : > { %s2621_s14 = sadd.s32 1, %s2505_s28   ;;  %s36_s15 = sadd.s32 1, %s2501_s27 }
   0x8   : > { %3083 = sst [smem:[#allocation10_spill]] %s2621_s14  ;;  %s33_s16 = ssub.s32 %s2505_s28, %s2621_s14 }
   0x9   : > { %p43_p0 = scmp.ne.s32.totalorder %s2501_s27, %s2497_s26  ;;  %p34_p1 = scmp.eq.s32.totalorder %s33_s16, 0 }
   0xa   : > { %p44_p2 = scmp.eq.s32.totalorder %s2505_s28, 0  ;;  %p49_p3 = scmp.ne.s32.totalorder %s2497_s26, %s2493_s25 }
   0xb   : > { %p50_p4 = scmp.eq.s32.totalorder %s2617_s29, 0  ;;  %p325_p7 = scmp.eq.s32.totalorder %s2617_s29, 1 }
   0xc   : > { %s2633_s17 = scalar_select %p34_p1, %s2501_s27, %s36_s15  }
   0xd   : > { %p2635_p5 = por %p44_p2, %p43_p0  ;;  %p2639_p6 = por %p50_p4, %p49_p3 }
   0xe   : > { %3084 = sst [smem:[#allocation11_spill]] %s2633_s17  ;;  %p331_p8 = scmp.eq.s32.totalorder %s2015_s30, 1 }
   0xf   : > { %p2298_p10 = scmp.lt.s32.totalorder %s2505_s28, 2  ;;  %p2646_p11 = por %p325_p7, %p43_p0 }
  0x10   : > { %p2650_p12 = por %p331_p8, %p49_p3  ;;  %s387_s22 = sand.u32 1, %s2501_s27  }
  0x11   : > { %s3087_s20 = scalar_select %p2646_p11, 1, 0 }
  0x12   : > { %s3088_s21 = scalar_select %p2650_p12, 1, 0 }
  0x13   : > { %s2073_s23 = sshll.u32 %s2505_s28, 8  ;;  %s2018_s24 = sshll.u32 %s387_s22, 4 }
  0x14   : > { %s2659_s17 = scalar_lea.hbm %s3062_s0, %s2073_s23  ;;  %s391_s30 = scalar_lea.vmem [#allocation2], %s2018_s24 }
  0x15   : > { %s398_s14 = sshll.u32 %s391_s30, 4  ;;  %p2663_p13 = pnand %p2298_p10, %p2635_p5  ;;  %s2667_s14 = int_to_ptr.vmem [resolvable:$true] %s398_s14 }
  0x16   : > { %s2669_s27 = scalar_lea.sflag [#allocation3], %s387_s22  ;;  %s2409_s15 = scalar_lea.hbm %s2659_s17, 256 }
  0x17   : > { %p2410_p0 = scmp.ne.s32.totalorder %s2659_s17, %s2409_s15  ;;  %p2411_p1 = pneg %p2663_p13 }
  0x18   : > { %s2414_s24 = scalar_lea.hbm %s3062_s0, 512  ;;  %p2415_p4 = scmp.lt.u32.totalorder %s2659_s17, %s3062_s0 }
  0x19   : > { %p2412_p2 = pnand %p2411_p1, %p2410_p0  ;;  %p2416_p5 = scmp.lt.u32.totalorder %s2414_s24, %s2409_s15 }
  0x1a   : > { %p2418_p8 = scmp.lt.u32.totalorder %s2409_s15, %s2659_s17 }
  0x1b   : > { %p2413_p3 = pneg %p2412_p2  ;;  %p2417_p7 = por %p2416_p5, %p2415_p4 }
  0x1d   : > { %p2419_p10 = por %p2418_p8, %p2417_p7 }
  0x1f   : > { %p2420_p9 = pnand %p2419_p10, %p2413_p3 }
  0x21   : > { %2423 = shalt.err (!%p2420_p9)
}
  0x22   : > { %s2424_s22 = scalar_lea.vmem %s2667_s14, 256  ;;  %s2507_s23 = smov [#allocation2]  }
  0x23   : > { %p2425_p0 = scmp.ne.s32.totalorder %s2667_s14, %s2424_s22  ;;  %s2429_s18 = sshll.u32 %s2507_s23, 4  ;;  %s2430_s18 = int_to_ptr.vmem [resolvable:$false] %s2429_s18 }
  0x24   : > { %s2431_s16 = scalar_lea.vmem %s2430_s18, 512  ;;  %p2432_p11 = scmp.lt.s32.totalorder %s2667_s14, %s2430_s18 }
  0x25   : > { %p2427_p2 = pnand %p2425_p0, %p2411_p1  ;;  %p2433_p4 = scmp.lt.s32.totalorder %s2431_s16, %s2424_s22 }
  0x27   : > { %p2428_p12 = pneg %p2427_p2  ;;  %p2434_p5 = por %p2433_p4, %p2432_p11 }
  0x29   : > { %p2435_p7 = pnand %p2434_p5, %p2428_p12 }
  0x2b   : > { %2438 = shalt.err (!%p2435_p7)
}
  0x2c   : > { %s2508_s15 = smov 128   ;;  %s2509_s24 = smov 8  }
  0x2d   : > { %2293 = dma.hbm_to_vmem [thread:$0]  (!%p2663_p13), %s2659_s17, 256, %s2667_s14, %s2669_s27, %s2508_s15, %s2508_s15, %s2509_s24  }
  0x2e   : > { %p2021_p9 = scmp.ge.s32.totalorder %s2505_s28, 1  ;;  %p406_p1 = scmp.lt.s32.totalorder %s2505_s28, 3 }
  0x30   : > { %p407_p3 = pnand %p2021_p9, %p406_p1 }
  0x31   : > { %s2700_s30 = sand.u32 (!%p407_p3), 1, %s2497_s26  }
  0x32   : > { %410 = sbr.rel (%p407_p3) target bundleno = 4527 (0x11af), region = 72  ;;  %s2022_s22 = sshll.u32 (!%p407_p3), %s2700_s30, 4 }
  0x33   : > { %s413_s23 = scalar_lea.sflag (!%p407_p3), [#allocation3], %s2700_s30  ;;  %s416_s18 = scalar_lea.vmem (!%p407_p3), [#allocation2], %s2022_s22 }
  0x39   : > { %2484 = dma.done.wait (%p2639_p6), %s413_s23, 256  }
  0x3a   : > { %2486 = vsyncadd (%p2639_p6), %s413_s23, 4294967040  ;;  %vm472_vm0 = vcmask 261120   ;;  %v2710_v0 = vld [vmem:[%s416_s18] sm:$0xff]  ;;  %v2712_v1 = vld [vmem:[%s416_s18 + $0x8] sm:$0xff]  ;;  %v2510_v15 = vmov 0.0   ;;  %vm2511_vm1 = vmmov 0   ;;  %v464_v51 = vlaneseq }
  0x3b   : > { %v473_v2 = vsel %vm472_vm0, %v2710_v0, 0.0  ;;  %v476_v3 = vsel %vm472_vm0, %v2712_v1, 0.0  ;;  %v2349_v14 = vld [vmem:[%s3065_s3] sm:$0xff]   ;;  %2130 = vmatprep.subr.bf16.mxu1 %v2510_v15  ;;  %2156 = vmatprep.subr.bf16.mxu0 %v2510_v15  ;;  %v2350_v16 = vld [vmem:[%s3065_s3 + $0x8] sm:$0xff]   ;;  %s2512_s25 = smov 96   ;;  %vm593_vm2 = vcmask 64512  }
  0x3c   : > { %474 = vadd.xlane.f32.xlu0 %v473_v2  ;;  %2131 = vmatpush3.bf16.msra.mxu1 %v2349_v14  ;;  %v2024_v25 = vld [vmem:[%s3063_s1] ss:$0 sm:$0xff]  ;;  %v465_v52 = vshrl.u32 %v464_v51, 7  ;;  %v467_v53 = vand.u32 127, %v464_v51  ;;  %s2513_s27 = smov 64   ;;  %s2514_s14 = smov 88  }
  0x3d   : > { %2134 = vmatprep.mubr.msk.bf16.mxu1 %vm2511_vm1, %v2510_v15  ;;  %2132 = vmatprep.subr.bf16.mxu1 %v2510_v15  ;;  %v2025_v29 = vld [vmem:[%s3064_s2] ss:$0 sm:$0xff]  ;;  %vm718_vm4 = vcmask 1043456   ;;  %s2515_s17 = smov 120   ;;  %s2516_s19 = smov 56  }
  0x3e   : > { %2158 = vmatprep.mubr.msk.bf16.mxu0 %vm2511_vm1, %v2510_v15  ;;  %v2026_v34 = vld [vmem:[%s3066_s4] ss:$0 sm:$0xff]  ;;  %vm468_vm3 = vcmp.gt.s32.totalorder %v467_v53, %v465_v52  ;;  %s2517_s16 = smov 80   ;;  %s2518_s15 = smov 112  }
  0x3f   : > { %v2771_v54 = vsel %vm468_vm3, -1e+09, %v2510_v15  ;;  %s2074_s18 = sshll.u32 %s2617_s29, 8  ;;  %s1929_s29 = scalar_lea.sflag [#allocation4], %s2700_s30 }
  0x40   : > { %477 = vadd.xlane.f32.xlu0 %v476_v3  ;;  %2133 = vmatpush3.bf16.msra.mxu1 %v2350_v16  ;;  %p3090_p11 = scmp.ne.s32.totalorder %s3087_s20, 0 }
  0x41   : > { %2138 = vmatprep.subr.bf16.mxu1 %v2510_v15 }
  0xc9   : > { %v475_v4 = vpop.xlane.xlu0 %474 }
  0xca   : > { %v480_v5 = vmul.f32 0.03125, %v475_v4 }
  0xcc   : > { %v482_v6 = vsub.f32 %v2710_v0, %v480_v5 }
  0xcd   : > { %v478_v7 = vpop.xlane.xlu0 %477 }
  0xce   : > { %v481_v8 = vmul.f32 0.03125, %v478_v7  ;;  %v484_v9 = vmul.f32 %v482_v6, %v482_v6 }
  0xd0   : > { %v483_v10 = vsub.f32 %v2712_v1, %v481_v8  ;;  %v486_v11 = vsel %vm472_vm0, %v484_v9, 0.0 }
  0xd1   : > { %487 = vadd.xlane.f32.xlu1 %v486_v11 }
  0xd2   : > { %v485_v12 = vmul.f32 %v483_v10, %v483_v10 }
  0xd4   : > { %v489_v13 = vsel %vm472_vm0, %v485_v12, 0.0 }
  0xd5   : > { %490 = vadd.xlane.f32.xlu1 %v489_v13 }
 0x15e   : > { %v488_v17 = vpop.xlane.xlu1 %487 }
 0x15f   : > { %v492_v18 = vmul.f32 0.03125, %v488_v17 }
 0x161   : > { %v494_v19 = vadd.f32 1e-05, %v492_v18 }
 0x162   : > { %v491_v20 = vpop.xlane.xlu1 %490 }
 0x163   : > { %2361 = vrsqrt.f32 %v494_v19  ;;  %v493_v21 = vmul.f32 0.03125, %v491_v20 }
 0x165   : > { %v495_v22 = vadd.f32 1e-05, %v493_v21 }
 0x167   : > { %2363 = vrsqrt.f32 %v495_v22 }
 0x16d   : > { %v2362_v23 = vpop.eup %2361 }
 0x16e   : > { %v498_v24 = vmul.f32 %v2362_v23, %v482_v6 }
 0x170   : > { %v506_v28 = vmul.f32 %v2024_v25, %v498_v24 }
 0x171   : > { %v2364_v26 = vpop.eup %2363 }
 0x172   : > { %v499_v27 = vmul.f32 %v2364_v26, %v483_v10  ;;  %v514_v31 = vadd.f32 %v2025_v29, %v506_v28 }
 0x174   : > { %v507_v30 = vmul.f32 %v2024_v25, %v499_v27 }
 0x176   : > { %v515_v32 = vadd.f32 %v2025_v29, %v507_v30 }
 0x178   : > { %v516_v33 = vpack.c.bf16 %v515_v32, %v514_v31 }
 0x17a   : > { %2135 = vmatmul.mubr.msk.bf16.vlgmr.msra.gmra.mrb[0].mxu1 %vm472_vm0, %v516_v33 }
 0x17b   : > { %2140 = vmatprep.mubr.msk.bf16.mxu1 %vm2511_vm1, %v2510_v15 }
 0x24d   : > { %v577_v35 = vpop.f32.mrb[0].mxu1 }
 0x24e   : > { %v578_v36 = vadd.f32 %v2026_v34, %v577_v35  ;;  %v2136_v37 = vpop.f32.mrb[1].mxu1 }
 0x24f   : > { %v580_v38 = vpop.f32.mrb[2].mxu1 }
 0x250   : > { %v2748_v39 = vpack.c.bf16 %v578_v36, %v578_v36  ;;  %v581_v40 = vadd.f32 %v2026_v34, %v580_v38  ;;  %v2137_v41 = vpop.f32.mrb[3].mxu1  ;;  %v584_v45 = vmul.f32 0.35355338, %v578_v36 }
 0x252   : > { %v2750_v42 = vpack.c.bf16 %v581_v40, %v581_v40  ;;  %591 = vrot.lane.b32.xlu0 %v2748_v39, %s2512_s25  ;;  %v2756_v47 = vpack.c.bf16 %v584_v45, %v584_v45  ;;  %v585_v49 = vmul.f32 0.35355338, %v581_v40 }
 0x254   : > { %641 = vrot.lane.b32.xlu1 %v2750_v42, %s2512_s25  ;;  %v2764_v50 = vpack.c.bf16 %v585_v49, %v585_v49  ;;  %s458_s25 = scalar_lea.vmem [#allocation5], %s2022_s22 }
 0x2c4   : > { %v592_v43 = vpop.permute.xlu0 %591 }
 0x2c5   : > { %v598_v44 = vsel %vm593_vm2, %v592_v43, 0 }
 0x2c6   : > { %2139 = vmatpush3.bf16.xpose.msra.mxu1 %v598_v44  ;;  %v642_v46 = vpop.permute.xlu1 %641 }
 0x2c7   : > { %2144 = vmatprep.subr.bf16.mxu1 %v2510_v15  ;;  %v647_v48 = vsel %vm593_vm2, %v642_v46, 0 }
 0x2cd   : > { %2141 = vmatmul.mubr.msk.bf16.vlgmr.msra.gmra.mrb[4].mxu1 %vm593_vm2, %v2756_v47 }
 0x2ce   : > { %2145 = vmatpush3.bf16.xpose.msra.mxu1 %v647_v48  ;;  %2146 = vmatprep.mubr.msk.bf16.mxu1 %vm2511_vm1, %v2510_v15 }
 0x2cf   : > { %2150 = vmatprep.subr.bf16.mxu1 %v2510_v15 }
 0x2d5   : > { %2147 = vmatmul.mubr.msk.bf16.vlgmr.msra.gmra.mrb[8].mxu1 %vm593_vm2, %v2764_v50 }
 0x2d6   : > { %2152 = vmatprep.mubr.msk.bf16.mxu1 %vm2511_vm1, %v2510_v15 }
 0x3a0   : > { %v634_v55 = vpop.f32.mrb[4].mxu1 }
 0x3a1   : > { %v635_v56 = vadd.f32 %v634_v55, %v2771_v54  ;;  %v2142_v57 = vpop.f32.mrb[5].mxu1 }
 0x3a2   : > { %v637_v58 = vpop.f32.mrb[6].mxu1 }
 0x3a3   : > { %v2143_v59 = vpop.f32.mrb[7].mxu1  ;;  %v689_v60 = vsel %vm593_vm2, %v635_v56, -inf }
 0x3a4   : > { %690 = vmax.xlane.f32.xlu1 %v689_v60 }
 0x3a8   : > { %v683_v61 = vpop.f32.mrb[8].mxu1 }
 0x3a9   : > { %v684_v62 = vadd.f32 %v683_v61, %v2771_v54  ;;  %v2148_v63 = vpop.f32.mrb[9].mxu1 }
 0x3aa   : > { %v686_v2 = vpop.f32.mrb[10].mxu1 }
 0x3ab   : > { %v2149_v3 = vpop.f32.mrb[11].mxu1  ;;  %v692_v4 = vsel %vm593_vm2, %v684_v62, -inf }
 0x3ac   : > { %693 = vmax.xlane.f32.xlu0 %v692_v4 }
 0x3b5   : > { %762 = vrot.lane.b32.xlu1 %v2750_v42, %s2513_s27 }
 0x3b9   : > { %815 = vrot.lane.b32.xlu1 %v2748_v39, %s2514_s14 }
 0x431   : > { %v691_v5 = vpop.xlane.xlu1 %690 }
 0x432   : > { %v695_v6 = vsub.f32 %v635_v56, %v691_v5 }
 0x434   : > { %v697_v7 = vmul.f32 1.442695, %v695_v6 }
 0x435   : > { %v763_v8 = vpop.permute.xlu1 %762 }
 0x436   : > { %2365 = vpow2.f32 %v697_v7  ;;  %v768_v9 = vsel %vm718_vm4, %v763_v8, 0 }
 0x437   : > { %2157 = vmatpush3.bf16.msra.mxu0 %v768_v9 }
 0x438   : > { %2168 = vmatprep.subr.bf16.mxu0 %v2510_v15 }
 0x439   : > { %v694_v10 = vpop.xlane.xlu0 %693  ;;  %v816_v19 = vpop.permute.xlu1 %815 }
 0x43a   : > { %v696_v11 = vsub.f32 %v684_v62, %v694_v10  ;;  %v821_v26 = vsel %vm593_vm2, %v816_v19, 0  ;;  %v811_v19 = vld [vmem:[%s3067_s5] sm:$0xf] }
 0x43c   : > { %v699_v12 = vmul.f32 1.442695, %v696_v11 }
 0x43e   : > { %2367 = vpow2.f32 %v699_v12 }
 0x440   : > { %v2366_v13 = vpop.eup %2365 }
 0x441   : > { %v701_v14 = vsel %vm593_vm2, %v2366_v13, 0.0 }
 0x442   : > { %702 = vadd.xlane.f32.xlu0 %v701_v14 }
 0x448   : > { %v2368_v16 = vpop.eup %2367 }
 0x449   : > { %v704_v17 = vsel %vm593_vm2, %v2368_v16, 0.0 }
 0x44a   : > { %705 = vadd.xlane.f32.xlu1 %v704_v17 }
 0x458   : > { %713 = vrot.lane.b32.xlu0 %v2748_v39, %s2513_s27  ;;  %s2519_s27 = smov 48  }
 0x45b   : > { %866 = vrot.lane.b32.xlu1 %v2750_v42, %s2514_s14  ;;  %s2520_s14 = smov 72  }
 0x45c   : > { %813 = vrot.lane.b32.xlu0 %v2756_v47, %s2515_s17 }
 0x45f   : > { %864 = vrot.lane.b32.xlu1 %v2764_v50, %s2515_s17  ;;  %s2521_s17 = smov 104  }
 0x4cf   : > { %v703_v18 = vpop.xlane.xlu0 %702 }
 0x4d0   : > { %2369 = vrcp.f32 %v703_v18 }
 0x4d3   : > { %v714_v20 = vpop.permute.xlu0 %713 }
 0x4d4   : > { %v720_v21 = vsel %vm718_vm4, %v714_v20, 0 }
 0x4d5   : > { %2151 = vmatpush3.bf16.msra.mxu1 %v720_v21 }
 0x4d6   : > { %2162 = vmatprep.subr.bf16.mxu1 %v2510_v15 }
 0x4d7   : > { %v706_v22 = vpop.xlane.xlu1 %705  ;;  %v814_v31 = vpop.permute.xlu0 %813 }
 0x4d8   : > { %2371 = vrcp.f32 %v706_v22  ;;  %v1087_v22 = vsel %vm718_vm4, %v811_v19, 0 }
 0x4da   : > { %v2370_v23 = vpop.eup %2369 }
 0x4db   : > { %v709_v24 = vmul.f32 %v2370_v23, %v2366_v13  ;;  %v867_v29 = vpop.permute.xlu1 %866 }
 0x4dc   : > { %v872_v32 = vsel %vm593_vm2, %v867_v29, 0 }
 0x4dd   : > { %v711_v25 = vpack.c.bf16 %v709_v24, %v709_v24 }
 0x4df   : > { %2153 = vmatmul.mubr.msk.bf16.vlgmr.msra.gmra.mrb[12].mxu1 %vm593_vm2, %v711_v25  ;;  %v865_v33 = vpop.permute.xlu1 %864 }
 0x4e0   : > { %2163 = vmatpush3.bf16.xpose.msra.mxu1 %v821_v26  ;;  %2164 = vmatprep.mubr.msk.bf16.mxu1 %vm2511_vm1, %v2510_v15 }
 0x4e1   : > { %2174 = vmatprep.subr.bf16.mxu1 %v2510_v15 }
 0x4e2   : > { %v2372_v27 = vpop.eup %2371 }
 0x4e3   : > { %v710_v28 = vmul.f32 %v2372_v27, %v2368_v16  ;;  %v1035_v27 = vld [vmem:[%s3067_s5 + $0x4] sm:$0xf] }
 0x4e5   : > { %v712_v30 = vpack.c.bf16 %v710_v28, %v710_v28  ;;  %v1040_v28 = vsel %vm718_vm4, %v1035_v27, 0 }
 0x4e7   : > { %2159 = vmatmul.mubr.msk.bf16.vlgmr.msra.gmra.mrb[0].mxu0 %vm593_vm2, %v712_v30  ;;  %2165 = vmatmul.mubr.msk.bf16.vlgmr.msra.gmra.mrb[16].mxu1 %vm593_vm2, %v814_v31 }
 0x4e8   : > { %2169 = vmatpush3.bf16.xpose.msra.mxu0 %v872_v32  ;;  %2170 = vmatprep.mubr.msk.bf16.mxu0 %vm2511_vm1, %v2510_v15 }
 0x4e9   : > { %2180 = vmatprep.subr.bf16.mxu0 %v2510_v15  ;;  %2176 = vmatprep.mubr.msk.bf16.mxu1 %vm2511_vm1, %v2510_v15 }
 0x4ef   : > { %2171 = vmatmul.mubr.msk.bf16.vlgmr.msra.gmra.mrb[4].mxu0 %vm593_vm2, %v865_v33 }
 0x4f0   : > { %2182 = vmatprep.mubr.msk.bf16.mxu0 %vm2511_vm1, %v2510_v15 }
 0x5b2   : > { %v2805_v34 = vpop.f32.mrb[12].mxu1 }
 0x5b3   : > { %v2154_v35 = vpop.f32.mrb[13].mxu1 }
 0x5b4   : > { %v759_v36 = vpop.f32.mrb[14].mxu1 }
 0x5b5   : > { %v2155_v37 = vpop.f32.mrb[15].mxu1 }
 0x5ba   : > { %v2807_v38 = vpop.f32.mrb[0].mxu0  ;;  %v857_v40 = vpop.f32.mrb[16].mxu1 }
 0x5bb   : > { %v810_v41 = vpack.c.bf16 %v2807_v38, %v2805_v34  ;;  %v858_v43 = vadd.f32 %v857_v40, %v2771_v54  ;;  %v2160_v44 = vpop.f32.mrb[1].mxu0  ;;  %v2166_v45 = vpop.f32.mrb[17].mxu1 }
 0x5bc   : > { %v807_v46 = vpop.f32.mrb[2].mxu0  ;;  %v860_v48 = vpop.f32.mrb[18].mxu1 }
 0x5bd   : > { %v2161_v49 = vpop.f32.mrb[3].mxu0  ;;  %v2167_v51 = vpop.f32.mrb[19].mxu1  ;;  %v914_v52 = vsel %vm593_vm2, %v858_v43, -inf }
 0x5be   : > { %915 = vmax.xlane.f32.xlu0 %v914_v52 }
 0x5c2   : > { %v908_v53 = vpop.f32.mrb[4].mxu0 }
 0x5c3   : > { %v909_v55 = vadd.f32 %v908_v53, %v2771_v54  ;;  %v2172_v56 = vpop.f32.mrb[5].mxu0 }
 0x5c4   : > { %v911_v57 = vpop.f32.mrb[6].mxu0 }
 0x5c5   : > { %v2173_v58 = vpop.f32.mrb[7].mxu0  ;;  %v917_v59 = vsel %vm593_vm2, %v909_v55, -inf }
 0x5c6   : > { %918 = vmax.xlane.f32.xlu1 %v917_v59 }
 0x5d7   : > { %986 = vrot.lane.b32.xlu1 %v2750_v42, %s2516_s19 }
 0x5db   : > { %1132 = vrot.lane.b32.xlu1 %v2748_v39, %s2517_s16 }
 0x5df   : > { %1182 = vrot.lane.b32.xlu1 %v2750_v42, %s2517_s16  ;;  %s2523_s16 = smov [#allocation5]  }
 0x5e3   : > { %1180 = vrot.lane.b32.xlu1 %v2764_v50, %s2518_s15 }
 0x64b   : > { %v916_v60 = vpop.xlane.xlu0 %915 }
 0x64c   : > { %v920_v61 = vsub.f32 %v858_v43, %v916_v60 }
 0x64e   : > { %v922_v62 = vmul.f32 1.442695, %v920_v61 }
 0x650   : > { %2373 = vpow2.f32 %v922_v62 }
 0x653   : > { %v919_v63 = vpop.xlane.xlu1 %918 }
 0x654   : > { %v921_v2 = vsub.f32 %v909_v55, %v919_v63 }
 0x656   : > { %v924_v3 = vmul.f32 1.442695, %v921_v2 }
 0x657   : > { %v987_v4 = vpop.permute.xlu1 %986 }
 0x658   : > { %2375 = vpow2.f32 %v924_v3  ;;  %v992_v5 = vsel %vm718_vm4, %v987_v4, 0 }
 0x659   : > { %2181 = vmatpush3.bf16.msra.mxu0 %v992_v5 }
 0x65a   : > { %v2374_v6 = vpop.eup %2373  ;;  %2192 = vmatprep.subr.bf16.mxu0 %v2510_v15 }
 0x65b   : > { %v926_v7 = vsel %vm593_vm2, %v2374_v6, 0.0  ;;  %v1133_v23 = vpop.permute.xlu1 %1132 }
 0x65c   : > { %927 = vadd.xlane.f32.xlu0 %v926_v7  ;;  %v1138_v37 = vsel %vm593_vm2, %v1133_v23, 0 }
 0x65f   : > { %v1183_v24 = vpop.permute.xlu1 %1182 }
 0x660   : > { %v1188_v25 = vsel %vm593_vm2, %v1183_v24, 0 }
 0x662   : > { %v2376_v8 = vpop.eup %2375 }
 0x663   : > { %v929_v9 = vsel %vm593_vm2, %v2376_v8, 0.0  ;;  %v1181_v26 = vpop.permute.xlu1 %1180 }
 0x664   : > { %930 = vadd.xlane.f32.xlu0 %v929_v9 }
 0x67a   : > { %938 = vrot.lane.b32.xlu0 %v2748_v39, %s2516_s19  ;;  %s3013_s19 = scalar_lea.hbm %s3075_s13, %s2074_s18 }
 0x67e   : > { %1130 = vrot.lane.b32.xlu0 %v2756_v47, %s2518_s15  ;;  %s2522_s15 = smov 40  }
 0x6e9   : > { %v928_v10 = vpop.xlane.xlu0 %927 }
 0x6ea   : > { %2377 = vrcp.f32 %v928_v10 }
 0x6f1   : > { %v931_v11 = vpop.xlane.xlu0 %930 }
 0x6f2   : > { %2379 = vrcp.f32 %v931_v11 }
 0x6f4   : > { %v2378_v12 = vpop.eup %2377 }
 0x6f5   : > { %v934_v13 = vmul.f32 %v2378_v12, %v2374_v6  ;;  %v939_v14 = vpop.permute.xlu0 %938 }
 0x6f6   : > { %v944_v16 = vsel %vm718_vm4, %v939_v14, 0 }
 0x6f7   : > { %2175 = vmatpush3.bf16.msra.mxu1 %v944_v16  ;;  %v936_v17 = vpack.c.bf16 %v934_v13, %v934_v13 }
 0x6f8   : > { %2186 = vmatprep.subr.bf16.mxu1 %v2510_v15 }
 0x6f9   : > { %v1131_v43 = vpop.permute.xlu0 %1130 }
 0x6fa   : > { %2177 = vmatmul.mubr.msk.bf16.vlgmr.msra.gmra.mrb[20].mxu1 %vm593_vm2, %v936_v17 }
 0x6fb   : > { %2188 = vmatprep.mubr.msk.bf16.mxu1 %vm2511_vm1, %v2510_v15  ;;  %2187 = vmatpush3.bf16.msra.mxu1 %v1040_v28 }
 0x6fc   : > { %v2380_v18 = vpop.eup %2379  ;;  %2198 = vmatprep.subr.bf16.mxu1 %v2510_v15 }
 0x6fd   : > { %v935_v20 = vmul.f32 %v2380_v18, %v2376_v8 }
 0x6ff   : > { %v937_v21 = vpack.c.bf16 %v935_v20, %v935_v20 }
 0x701   : > { %2183 = vmatmul.mubr.msk.bf16.vlgmr.msra.gmra.mrb[8].mxu0 %vm593_vm2, %v937_v21 }
 0x702   : > { %2193 = vmatpush3.bf16.msra.mxu0 %v1087_v22  ;;  %2194 = vmatprep.mubr.msk.bf16.mxu0 %vm2511_vm1, %v2510_v15 }
 0x703   : > { %2204 = vmatprep.subr.bf16.mxu0 %v2510_v15 }
 0x709   : > { %2195 = vmatmul.mubr.msk.bf16.vlgmr.msra.gmra.mrb[12].mxu0 %vm593_vm2, %v810_v41 }
 0x70a   : > { %2206 = vmatprep.mubr.msk.bf16.mxu0 %vm2511_vm1, %v2510_v15 }
 0x70b   : > { %2205 = vmatpush3.bf16.xpose.msra.mxu0 %v1188_v25 }
 0x70c   : > { %2216 = vmatprep.subr.bf16.mxu0 %v2510_v15 }
 0x712   : > { %2207 = vmatmul.mubr.msk.bf16.vlgmr.msra.gmra.mrb[16].mxu0 %vm593_vm2, %v1181_v26 }
 0x713   : > { %2218 = vmatprep.mubr.msk.bf16.mxu0 %vm2511_vm1, %v2510_v15 }
 0x7cd   : > { %v980_v29 = vpop.f32.mrb[20].mxu1 }
 0x7ce   : > { %v2178_v30 = vpop.f32.mrb[21].mxu1 }
 0x7cf   : > { %v983_v31 = vpop.f32.mrb[22].mxu1 }
 0x7d0   : > { %v2179_v32 = vpop.f32.mrb[23].mxu1 }
 0x7d4   : > { %v1028_v33 = vpop.f32.mrb[8].mxu0 }
 0x7d5   : > { %v1034_v34 = vpack.c.bf16 %v1028_v33, %v980_v29  ;;  %v2184_v35 = vpop.f32.mrb[9].mxu0  ;;  %v1351_v33 = vld [vmem:[%s3067_s5 + $0x8] sm:$0xf] }
 0x7d6   : > { %v1031_v36 = vpop.f32.mrb[10].mxu0 }
 0x7d7   : > { %v2185_v38 = vpop.f32.mrb[11].mxu0  ;;  %2189 = vmatmul.mubr.msk.bf16.vlgmr.msra.gmra.mrb[24].mxu1 %vm593_vm2, %v1034_v34  ;;  %v1356_v34 = vsel %vm718_vm4, %v1351_v33, 0 }
 0x7d8   : > { %2199 = vmatpush3.bf16.xpose.msra.mxu1 %v1138_v37  ;;  %2200 = vmatprep.mubr.msk.bf16.mxu1 %vm2511_vm1, %v2510_v15 }
 0x7d9   : > { %2210 = vmatprep.subr.bf16.mxu1 %v2510_v15 }
 0x7dc   : > { %v1123_v40 = vpop.f32.mrb[12].mxu0 }
 0x7dd   : > { %v2196_v41 = vpop.f32.mrb[13].mxu0 }
 0x7de   : > { %v1126_v44 = vpop.f32.mrb[14].mxu0 }
 0x7df   : > { %v2197_v45 = vpop.f32.mrb[15].mxu0  ;;  %2201 = vmatmul.mubr.msk.bf16.vlgmr.msra.gmra.mrb[28].mxu1 %vm593_vm2, %v1131_v43 }
 0x7e0   : > { %2212 = vmatprep.mubr.msk.bf16.mxu1 %vm2511_vm1, %v2510_v15 }
 0x7e5   : > { %v1224_v46 = vpop.f32.mrb[16].mxu0 }
 0x7e6   : > { %v1225_v48 = vadd.f32 %v1224_v46, %v2771_v54  ;;  %v2208_v49 = vpop.f32.mrb[17].mxu0 }
 0x7e7   : > { %v1227_v51 = vpop.f32.mrb[18].mxu0 }
 0x7e8   : > { %v2209_v52 = vpop.f32.mrb[19].mxu0  ;;  %v1233_v53 = vsel %vm593_vm2, %v1225_v48, -inf }
 0x7e9   : > { %1234 = vmax.xlane.f32.xlu1 %v1233_v53 }
 0x7fa   : > { %1302 = vrot.lane.b32.xlu1 %v2750_v42, %s2519_s27 }
 0x7fe   : > { %1403 = vrot.lane.b32.xlu1 %v2748_v39, %s2520_s14 }
 0x802   : > { %1453 = vrot.lane.b32.xlu1 %v2750_v42, %s2520_s14 }
 0x806   : > { %1451 = vrot.lane.b32.xlu1 %v2764_v50, %s2521_s17 }
 0x876   : > { %v1235_v55 = vpop.xlane.xlu1 %1234 }
 0x877   : > { %v1237_v58 = vsub.f32 %v1225_v48, %v1235_v55 }
 0x879   : > { %v1240_v59 = vmul.f32 1.442695, %v1237_v58 }
 0x87a   : > { %v1303_v56 = vpop.permute.xlu1 %1302 }
 0x87b   : > { %v1308_v57 = vsel %vm718_vm4, %v1303_v56, 0  ;;  %2381 = vpow2.f32 %v1240_v59 }
 0x87c   : > { %2217 = vmatpush3.bf16.msra.mxu0 %v1308_v57 }
 0x87d   : > { %2228 = vmatprep.subr.bf16.mxu0 %v2510_v15 }
 0x87e   : > { %v1404_v20 = vpop.permute.xlu1 %1403 }
 0x87f   : > { %v1409_v22 = vsel %vm593_vm2, %v1404_v20, 0 }
 0x882   : > { %v1454_v43 = vpop.permute.xlu1 %1453 }
 0x883   : > { %v1459_v49 = vsel %vm593_vm2, %v1454_v43, 0 }
 0x885   : > { %v2382_v9 = vpop.eup %2381 }
 0x886   : > { %v1245_v10 = vsel %vm593_vm2, %v2382_v9, 0.0  ;;  %v1452_v52 = vpop.permute.xlu1 %1451 }
 0x8aa   : > { %v1076_v60 = vpop.f32.mrb[24].mxu1 }
 0x8ab   : > { %v2872_v61 = vadd.f32 %v1123_v40, %v1076_v60  ;;  %v2190_v62 = vpop.f32.mrb[25].mxu1 }
 0x8ac   : > { %v1079_v63 = vpop.f32.mrb[26].mxu1 }
 0x8ad   : > { %v2874_v2 = vadd.f32 %v1126_v44, %v1079_v63  ;;  %v2191_v3 = vpop.f32.mrb[27].mxu1 }
 0x8b2   : > { %v1174_v4 = vpop.f32.mrb[28].mxu1 }
 0x8b3   : > { %v1175_v50 = vadd.f32 %v1174_v4, %v2771_v54  ;;  %v2202_v5 = vpop.f32.mrb[29].mxu1 }
 0x8b4   : > { %v1177_v6 = vpop.f32.mrb[30].mxu1 }
 0x8b5   : > { %v2203_v7 = vpop.f32.mrb[31].mxu1  ;;  %v1230_v8 = vsel %vm593_vm2, %v1175_v50, -inf }
 0x8b6   : > { %1231 = vmax.xlane.f32.xlu0 %v1230_v8 }
 0x8ba   : > { %1246 = vadd.xlane.f32.xlu0 %v1245_v10 }
 0x943   : > { %v1232_v11 = vpop.xlane.xlu0 %1231 }
 0x944   : > { %v1236_v12 = vsub.f32 %v1175_v50, %v1232_v11 }
 0x946   : > { %v1238_v13 = vmul.f32 1.442695, %v1236_v12 }
 0x947   : > { %v1247_v14 = vpop.xlane.xlu0 %1246 }
 0x948   : > { %2383 = vpow2.f32 %v1238_v13 }
 0x949   : > { %2385 = vrcp.f32 %v1247_v14 }
 0x952   : > { %v2384_v16 = vpop.eup %2383 }
 0x953   : > { %v2386_v17 = vpop.eup %2385  ;;  %v1242_v18 = vsel %vm593_vm2, %v2384_v16, 0.0 }
 0x954   : > { %v1251_v19 = vmul.f32 %v2386_v17, %v2382_v9  ;;  %1243 = vadd.xlane.f32.xlu0 %v1242_v18 }
 0x956   : > { %v1253_v21 = vpack.c.bf16 %v1251_v19, %v1251_v19 }
 0x958   : > { %2219 = vmatmul.mubr.msk.bf16.vlgmr.msra.gmra.mrb[20].mxu0 %vm593_vm2, %v1253_v21 }
 0x959   : > { %2229 = vmatpush3.bf16.xpose.msra.mxu0 %v1409_v22  ;;  %2230 = vmatprep.mubr.msk.bf16.mxu0 %vm2511_vm1, %v2510_v15 }
 0x95a   : > { %2240 = vmatprep.subr.bf16.mxu0 %v2510_v15 }
 0x96a   : > { %1254 = vrot.lane.b32.xlu0 %v2748_v39, %s2519_s27  ;;  %s1942_s27 = sshll.u32 %s458_s25, 4  ;;  %s3015_s27 = int_to_ptr.vmem [resolvable:$true] %s1942_s27 }
 0x96b   : > { %s2439_s22 = scalar_lea.vmem %s3015_s27, 256 }
 0x96c   : > { %p2440_p6 = scmp.ne.s32.totalorder %s3015_s27, %s2439_s22 }
 0x96e   : > { %1401 = vrot.lane.b32.xlu0 %v2756_v47, %s2521_s17  ;;  %p2441_p12 = pnand %p2440_p6, %p3090_p11 }
 0x970   : > { %p2442_p13 = pneg %p2441_p12 }
 0x9e1   : > { %v1244_v23 = vpop.xlane.xlu0 %1243 }
 0x9e2   : > { %2387 = vrcp.f32 %v1244_v23  ;;  %v1622_v23 = vld [vmem:[%s3067_s5 + $0xc] sm:$0xf] }
 0x9e5   : > { %v1255_v24 = vpop.permute.xlu0 %1254 }
 0x9e6   : > { %v1260_v25 = vsel %vm718_vm4, %v1255_v24, 0  ;;  %v1627_v24 = vsel %vm718_vm4, %v1622_v23, 0 }
 0x9e7   : > { %2211 = vmatpush3.bf16.msra.mxu1 %v1260_v25 }
 0x9e8   : > { %2222 = vmatprep.subr.bf16.mxu1 %v2510_v15 }
 0x9e9   : > { %v1402_v26 = vpop.permute.xlu0 %1401 }
 0x9ea   : > { %2231 = vmatmul.mubr.msk.bf16.vlgmr.msra.gmra.mrb[24].mxu0 %vm593_vm2, %v1402_v26 }
 0x9eb   : > { %2242 = vmatprep.mubr.msk.bf16.mxu0 %vm2511_vm1, %v2510_v15 }
 0x9ec   : > { %v2388_v27 = vpop.eup %2387 }
 0x9ed   : > { %v1250_v28 = vmul.f32 %v2388_v27, %v2384_v16 }
 0x9ef   : > { %v1252_v29 = vpack.c.bf16 %v1250_v28, %v1250_v28 }
 0x9f1   : > { %2213 = vmatmul.mubr.msk.bf16.vlgmr.msra.gmra.mrb[32].mxu1 %vm593_vm2, %v1252_v29 }
 0x9f2   : > { %2224 = vmatprep.mubr.msk.bf16.mxu1 %vm2511_vm1, %v2510_v15  ;;  %2223 = vmatpush3.bf16.msra.mxu1 %v1356_v34 }
 0x9f3   : > { %2234 = vmatprep.subr.bf16.mxu1 %v2510_v15 }
 0xa2b   : > { %v1344_v47 = vpop.f32.mrb[20].mxu0 }
 0xa2c   : > { %v2220_v30 = vpop.f32.mrb[21].mxu0 }
 0xa2d   : > { %v1347_v31 = vpop.f32.mrb[22].mxu0 }
 0xa2e   : > { %v2221_v32 = vpop.f32.mrb[23].mxu0 }
 0xabd   : > { %v1445_v35 = vpop.f32.mrb[24].mxu0 }
 0xabe   : > { %v1446_v36 = vadd.f32 %v1445_v35, %v2771_v54  ;;  %v2232_v37 = vpop.f32.mrb[25].mxu0 }
 0xabf   : > { %v1448_v38 = vpop.f32.mrb[26].mxu0 }
 0xac0   : > { %v2233_v40 = vpop.f32.mrb[27].mxu0  ;;  %v1501_v41 = vsel %vm593_vm2, %v1446_v36, -inf }
 0xac1   : > { %1502 = vmax.xlane.f32.xlu0 %v1501_v41 }
 0xac4   : > { %v1296_v44 = vpop.f32.mrb[32].mxu1 }
 0xac5   : > { %v1350_v45 = vpack.c.bf16 %v1344_v47, %v1296_v44  ;;  %v2214_v46 = vpop.f32.mrb[33].mxu1 }
 0xac6   : > { %v1299_v48 = vpop.f32.mrb[34].mxu1 }
 0xac7   : > { %v2215_v51 = vpop.f32.mrb[35].mxu1  ;;  %2225 = vmatmul.mubr.msk.bf16.vlgmr.msra.gmra.mrb[36].mxu1 %vm593_vm2, %v1350_v45 }
 0xac8   : > { %2235 = vmatpush3.bf16.xpose.msra.mxu1 %v1459_v49  ;;  %2236 = vmatprep.mubr.msk.bf16.mxu1 %vm2511_vm1, %v2510_v15 }
 0xac9   : > { %2246 = vmatprep.subr.bf16.mxu1 %v2510_v15 }
 0xacf   : > { %2237 = vmatmul.mubr.msk.bf16.vlgmr.msra.gmra.mrb[40].mxu1 %vm593_vm2, %v1452_v52 }
 0xad0   : > { %2248 = vmatprep.mubr.msk.bf16.mxu1 %vm2511_vm1, %v2510_v15 }
 0xb4e   : > { %v1503_v53 = vpop.xlane.xlu0 %1502 }
 0xb4f   : > { %v1507_v55 = vsub.f32 %v1446_v36, %v1503_v53  ;;  %v2050_v36 = vld [vmem:[%s3068_s6] ss:$0 sm:$0xff] }
 0xb51   : > { %v1509_v56 = vmul.f32 1.442695, %v1507_v55 }
 0xb53   : > { %2389 = vpow2.f32 %v1509_v56 }
 0xb5d   : > { %v2390_v57 = vpop.eup %2389 }
 0xb5e   : > { %v1513_v58 = vsel %vm593_vm2, %v2390_v57, 0.0 }
 0xb5f   : > { %1514 = vadd.xlane.f32.xlu0 %v1513_v58 }
 0xb9a   : > { %v1392_v59 = vpop.f32.mrb[36].mxu1 }
 0xb9b   : > { %v1399_v60 = vadd.f32 %v1392_v59, %v2872_v61  ;;  %v2226_v62 = vpop.f32.mrb[37].mxu1  ;;  %v2351_v59 = vld [vmem:[%s3071_s9] sm:$0xff]  }
 0xb9c   : > { %v1395_v63 = vpop.f32.mrb[38].mxu1 }
 0xb9d   : > { %v1400_v3 = vadd.f32 %v1395_v63, %v2874_v2  ;;  %v2227_v4 = vpop.f32.mrb[39].mxu1 }
 0xba2   : > { %v1495_v50 = vpop.f32.mrb[40].mxu1 }
 0xba3   : > { %v1496_v5 = vadd.f32 %v1495_v50, %v2771_v54  ;;  %v2238_v6 = vpop.f32.mrb[41].mxu1 }
 0xba4   : > { %v1498_v7 = vpop.f32.mrb[42].mxu1 }
 0xba5   : > { %v2239_v8 = vpop.f32.mrb[43].mxu1  ;;  %v1504_v9 = vsel %vm593_vm2, %v1496_v5, -inf  ;;  %v2051_v7 = vld [vmem:[%s3069_s7] ss:$0 sm:$0xff] }
 0xba6   : > { %1505 = vmax.xlane.f32.xlu1 %v1504_v9 }
 0xbb7   : > { %1573 = vrot.lane.b32.xlu1 %v2750_v42, %s2522_s15 }
 0xbec   : > { %v1515_v14 = vpop.xlane.xlu0 %1514 }
 0xc33   : > { %v1506_v10 = vpop.xlane.xlu1 %1505 }
 0xc34   : > { %v1508_v11 = vsub.f32 %v1496_v5, %v1506_v10 }
 0xc36   : > { %v1511_v61 = vmul.f32 1.442695, %v1508_v11 }
 0xc37   : > { %v1574_v12 = vpop.permute.xlu1 %1573 }
 0xc38   : > { %2391 = vpow2.f32 %v1511_v61  ;;  %v1579_v2 = vsel %vm718_vm4, %v1574_v12, 0  ;;  %v2052_v61 = vld [vmem:[%s3070_s8] ss:$0 sm:$0xff] }
 0xc39   : > { %2247 = vmatpush3.bf16.msra.mxu1 %v1579_v2  ;;  %2393 = vrcp.f32 %v1515_v14  ;;  %v2353_v14 = vld [vmem:[%s3073_s11] sm:$0xff]  }
 0xc3a   : > { %2258 = vmatprep.subr.bf16.mxu1 %v2510_v15 }
 0xc42   : > { %v2392_v54 = vpop.eup %2391 }
 0xc43   : > { %v1516_v13 = vsel %vm593_vm2, %v2392_v54, 0.0  ;;  %v2394_v16 = vpop.eup %2393 }
 0xc44   : > { %1517 = vadd.xlane.f32.xlu0 %v1516_v13  ;;  %v1521_v17 = vmul.f32 %v2394_v16, %v2390_v57  ;;  %v2354_v16 = vld [vmem:[%s3073_s11 + $0x8] sm:$0xff]  }
 0xc46   : > { %v1523_v20 = vpack.c.bf16 %v1521_v17, %v1521_v17  ;;  %v2356_v17 = vld [vmem:[%s3073_s11 + $0x18] sm:$0xff]  }
 0xc5a   : > { %1525 = vrot.lane.b32.xlu0 %v2748_v39, %s2522_s15  ;;  %s2443_s15 = sshll.u32 %s2523_s16, 4  ;;  %s2444_s15 = int_to_ptr.vmem [resolvable:$false] %s2443_s15 }
 0xc5b   : > { %s2445_s24 = scalar_lea.vmem %s2444_s15, 512  ;;  %p2446_p8 = scmp.lt.s32.totalorder %s3015_s27, %s2444_s15 }
 0xc5c   : > { %p2447_p10 = scmp.lt.s32.totalorder %s2445_s24, %s2439_s22 }
 0xc5e   : > { %p2448_p0 = por %p2447_p10, %p2446_p8 }
 0xc60   : > { %p2449_p2 = pnand %p2448_p0, %p2442_p13 }
 0xcd1   : > { %v1518_v42 = vpop.xlane.xlu0 %1517 }
 0xcd2   : > { %2395 = vrcp.f32 %v1518_v42  ;;  %v2355_v42 = vld [vmem:[%s3073_s11 + $0x10] sm:$0xff]  }
 0xcd5   : > { %v1526_v18 = vpop.permute.xlu0 %1525 }
 0xcd6   : > { %v1531_v19 = vsel %vm718_vm4, %v1526_v18, 0  ;;  %v2357_v18 = vld [vmem:[%s3073_s11 + $0x20] sm:$0xff]  }
 0xcd7   : > { %2241 = vmatpush3.bf16.msra.mxu0 %v1531_v19  ;;  %v2358_v19 = vld [vmem:[%s3073_s11 + $0x28] sm:$0xff]  }
 0xcd8   : > { %2252 = vmatprep.subr.bf16.mxu0 %v2510_v15 }
 0xcda   : > { %2243 = vmatmul.mubr.msk.bf16.vlgmr.msra.gmra.mrb[28].mxu0 %vm593_vm2, %v1523_v20  ;;  %v2359_v20 = vld [vmem:[%s3073_s11 + $0x30] sm:$0xff]  }
 0xcdb   : > { %2254 = vmatprep.mubr.msk.bf16.mxu0 %vm2511_vm1, %v2510_v15  ;;  %2253 = vmatpush3.bf16.msra.mxu0 %v1627_v24 }
 0xcdc   : > { %v2396_v21 = vpop.eup %2395  ;;  %2266 = vmatprep.subr.bf16.mxu0 %v2510_v15 }
 0xcdd   : > { %v1522_v39 = vmul.f32 %v2396_v21, %v2392_v54  ;;  %v2360_v21 = vld [vmem:[%s3073_s11 + $0x38] sm:$0xff]  }
 0xcdf   : > { %v1524_v22 = vpack.c.bf16 %v1522_v39, %v1522_v39  ;;  %v2053_v39 = vld [vmem:[%s3072_s10] ss:$0 sm:$0xff] }
 0xce1   : > { %2249 = vmatmul.mubr.msk.bf16.vlgmr.msra.gmra.mrb[44].mxu1 %vm593_vm2, %v1524_v22 }
 0xce2   : > { %2262 = vmatprep.mubr.msk.bf16.mxu1 %vm2511_vm1, %v2510_v15  ;;  %2259 = vmatpush3.bf16.msra.mxu1 %v2351_v59 }
 0xce3   : > { %2260 = vmatprep.subr.bf16.mxu1 %v2510_v15 }
 0xdad   : > { %v1567_v25 = vpop.f32.mrb[28].mxu0 }
 0xdae   : > { %v2244_v26 = vpop.f32.mrb[29].mxu0 }
 0xdaf   : > { %v1570_v27 = vpop.f32.mrb[30].mxu0 }
 0xdb0   : > { %v2245_v28 = vpop.f32.mrb[31].mxu0 }
 0xdb4   : > { %v1615_v29 = vpop.f32.mrb[44].mxu1 }
 0xdb5   : > { %v1621_v47 = vpack.c.bf16 %v1615_v29, %v1567_v25  ;;  %v2250_v30 = vpop.f32.mrb[45].mxu1 }
 0xdb6   : > { %v1618_v31 = vpop.f32.mrb[46].mxu1 }
 0xdb7   : > { %v2251_v32 = vpop.f32.mrb[47].mxu1  ;;  %2255 = vmatmul.mubr.msk.bf16.vlgmr.msra.gmra.mrb[32].mxu0 %vm593_vm2, %v1621_v47 }
 0xdb8   : > { %2282 = vmatprep.mubr.msk.bf16.mxu0 %vm2511_vm1, %v2510_v15  ;;  %2267 = vmatpush3.bf16.msra.mxu0 %v2353_v14 }
 0xdb9   : > { %2268 = vmatprep.subr.bf16.mxu0 %v2510_v15 }
 0xdbc   : > { %2269 = vmatpush3.bf16.msra.mxu0 %v2354_v16 }
 0xdbd   : > { %2270 = vmatprep.subr.bf16.mxu0 %v2510_v15 }
 0xdc0   : > { %2271 = vmatpush3.bf16.msra.mxu0 %v2355_v42 }
 0xdc1   : > { %2272 = vmatprep.subr.bf16.mxu0 %v2510_v15 }
 0xdc4   : > { %2273 = vmatpush3.bf16.msra.mxu0 %v2356_v17 }
 0xdc5   : > { %2274 = vmatprep.subr.bf16.mxu0 %v2510_v15 }
 0xdc8   : > { %2275 = vmatpush3.bf16.msra.mxu0 %v2357_v18 }
 0xdc9   : > { %2276 = vmatprep.subr.bf16.mxu0 %v2510_v15 }
 0xdcc   : > { %2277 = vmatpush3.bf16.msra.mxu0 %v2358_v19 }
 0xdcd   : > { %2278 = vmatprep.subr.bf16.mxu0 %v2510_v15 }
 0xdd0   : > { %2279 = vmatpush3.bf16.msra.mxu0 %v2359_v20 }
 0xdd1   : > { %2280 = vmatprep.subr.bf16.mxu0 %v2510_v15 }
 0xdd4   : > { %2281 = vmatpush3.bf16.msra.mxu0 %v2360_v21 }
 0xe8a   : > { %v1663_v33 = vpop.f32.mrb[32].mxu0 }
 0xe8b   : > { %v1670_v34 = vadd.f32 %v1663_v33, %v1399_v60  ;;  %v2256_v35 = vpop.f32.mrb[33].mxu0  ;;  %v2352_v60 = vld [vmem:[%s3071_s9 + $0x8] sm:$0xff]  }
 0xe8c   : > { %v1666_v37 = vpop.f32.mrb[34].mxu0  ;;  %2261 = vmatpush3.bf16.msra.mxu1 %v2352_v60 }
 0xe8d   : > { %v1672_v38 = vadd.f32 %v1670_v34, %v2710_v0  ;;  %v1671_v40 = vadd.f32 %v1666_v37, %v1400_v3  ;;  %v2257_v41 = vpop.f32.mrb[35].mxu0 }
 0xe8f   : > { %v2942_v43 = vadd.f32 %v2050_v36, %v1672_v38  ;;  %v1673_v44 = vadd.f32 %v1671_v40, %v2712_v1  ;;  %v2059_v40 = vld [vmem:[%s3074_s12] ss:$0 sm:$0xff] }
 0xe91   : > { %v2945_v45 = vadd.f32 %v2050_v36, %v1673_v44  ;;  %v1685_v46 = vsel %vm472_vm0, %v2942_v43, 0.0 }
 0xe92   : > { %1686 = vadd.xlane.f32.xlu1 %v1685_v46 }
 0xe93   : > { %v1688_v48 = vsel %vm472_vm0, %v2945_v45, 0.0 }
 0xe94   : > { %1689 = vadd.xlane.f32.xlu0 %v1688_v48 }
 0xf1f   : > { %v1687_v49 = vpop.xlane.xlu1 %1686 }
 0xf20   : > { %v1691_v51 = vmul.f32 0.03125, %v1687_v49 }
 0xf21   : > { %v1690_v52 = vpop.xlane.xlu0 %1689 }
 0xf22   : > { %v1693_v0 = vsub.f32 %v2942_v43, %v1691_v51  ;;  %v1692_v53 = vmul.f32 0.03125, %v1690_v52 }
 0xf24   : > { %v1694_v55 = vsub.f32 %v2945_v45, %v1692_v53  ;;  %v1695_v56 = vmul.f32 %v1693_v0, %v1693_v0 }
 0xf26   : > { %v1697_v1 = vsel %vm472_vm0, %v1695_v56, 0.0  ;;  %v1696_v57 = vmul.f32 %v1694_v55, %v1694_v55 }
 0xf27   : > { %1698 = vadd.xlane.f32.xlu0 %v1697_v1 }
 0xf28   : > { %v1700_v58 = vsel %vm472_vm0, %v1696_v57, 0.0 }
 0xf29   : > { %1701 = vadd.xlane.f32.xlu1 %v1700_v58 }
 0xfb4   : > { %v1699_v62 = vpop.xlane.xlu0 %1698 }
 0xfb5   : > { %v1703_v63 = vmul.f32 0.03125, %v1699_v62 }
 0xfb6   : > { %v1702_v3 = vpop.xlane.xlu1 %1701 }
 0xfb7   : > { %v1705_v4 = vadd.f32 1e-05, %v1703_v63  ;;  %v1704_v50 = vmul.f32 0.03125, %v1702_v3 }
 0xfb9   : > { %2397 = vrsqrt.f32 %v1705_v4  ;;  %v1706_v5 = vadd.f32 1e-05, %v1704_v50 }
 0xfbb   : > { %2399 = vrsqrt.f32 %v1706_v5 }
 0xfc3   : > { %v2398_v6 = vpop.eup %2397 }
 0xfc4   : > { %v1709_v8 = vmul.f32 %v2398_v6, %v1693_v0 }
 0xfc5   : > { %v2400_v9 = vpop.eup %2399 }
 0xfc6   : > { %v1717_v10 = vmul.f32 %v2051_v7, %v1709_v8  ;;  %v1710_v11 = vmul.f32 %v2400_v9, %v1694_v55 }
 0xfc8   : > { %v1718_v12 = vmul.f32 %v2051_v7, %v1710_v11  ;;  %v1725_v2 = vadd.f32 %v2052_v61, %v1717_v10 }
 0xfca   : > { %v1726_v54 = vadd.f32 %v2052_v61, %v1718_v12 }
 0xfcc   : > { %v1727_v13 = vpack.c.bf16 %v1726_v54, %v1725_v2 }
 0xfce   : > { %2263 = vmatmul.mubr.msk.bf16.vlgmr.msra.gmra.mrb[48].mxu1 %vm472_vm0, %v1727_v13 }
0x10a1   : > { %v1788_v22 = vpop.f32.mrb[48].mxu1 }
0x10a2   : > { %v1789_v23 = vadd.f32 %v2053_v39, %v1788_v22  ;;  %v2264_v24 = vpop.f32.mrb[49].mxu1 }
0x10a3   : > { %v1791_v25 = vpop.f32.mrb[50].mxu1 }
0x10a4   : > { %v2057_v26 = vmul.f32 -1.702, %v1789_v23  ;;  %v1792_v27 = vadd.f32 %v2053_v39, %v1791_v25  ;;  %v2265_v28 = vpop.f32.mrb[51].mxu1 }
0x10a6   : > { %v1799_v29 = vmul.f32 1.442695, %v2057_v26  ;;  %v2058_v47 = vmul.f32 -1.702, %v1792_v27 }
0x10a8   : > { %2401 = vpow2.f32 %v1799_v29  ;;  %v1801_v15 = vmul.f32 1.442695, %v2058_v47 }
0x10aa   : > { %2403 = vpow2.f32 %v1801_v15 }
0x10b2   : > { %v2402_v30 = vpop.eup %2401 }
0x10b3   : > { %v1803_v31 = vadd.f32 1.0, %v2402_v30 }
0x10b4   : > { %v2404_v32 = vpop.eup %2403 }
0x10b5   : > { %2405 = vrcp.f32 %v1803_v31  ;;  %v1804_v33 = vadd.f32 1.0, %v2404_v32 }
0x10b7   : > { %2407 = vrcp.f32 %v1804_v33 }
0x10bf   : > { %v2406_v34 = vpop.eup %2405 }
0x10c0   : > { %v1809_v36 = vmul.f32 %v2406_v34, %v1789_v23 }
0x10c1   : > { %v2408_v35 = vpop.eup %2407 }
0x10c2   : > { %v1810_v37 = vmul.f32 %v2408_v35, %v1792_v27 }
0x10c4   : > { %v1811_v38 = vpack.c.bf16 %v1810_v37, %v1809_v36 }
0x10c6   : > { %2283 = vmatmul.mubr.bf16.vlgmr.msra.gmra.mrb[36].mxu0 %v1811_v38 }
0x1199   : > { %v1917_v41 = vpop.f32.mrb[36].mxu0 }
0x119a   : > { %v1918_v44 = vadd.f32 %v2059_v40, %v1917_v41  ;;  %v2284_v46 = vpop.f32.mrb[37].mxu0 }
0x119b   : > { %v1920_v48 = vpop.f32.mrb[38].mxu0 }
0x119c   : > { %v1924_v49 = vadd.f32 %v1918_v44, %v2942_v43  ;;  %v1921_v51 = vadd.f32 %v2059_v40, %v1920_v48  ;;  %v2285_v52 = vpop.f32.mrb[39].mxu0 }
0x119e   : > { %1926 = vst.msk [vmem:[%s458_s25] sm:$0xff] %vm472_vm0, %v1924_v49  ;;  %v1925_v0 = vadd.f32 %v1921_v51, %v2945_v45 }
0x11a0   : > { %1927 = vst.msk [vmem:[%s458_s25 + $0x8] sm:$0xff] %vm472_vm0, %v1925_v0 }
0x11a1   : > { %2452 = shalt.err (!%p2449_p2)
}
0x11a2   : > { %s2453_s23 = scalar_lea.hbm %s3013_s19, 256  ;;  %s2457_s14 = scalar_lea.hbm %s3075_s13, 512 }
0x11a3   : > { %p2454_p4 = scmp.ne.s32.totalorder %s3013_s19, %s2453_s23  ;;  %p2458_p9 = scmp.lt.u32.totalorder %s3013_s19, %s3075_s13 }
0x11a4   : > { %p2459_p1 = scmp.lt.u32.totalorder %s2457_s14, %s2453_s23  ;;  %p2461_p6 = scmp.lt.u32.totalorder %s2453_s23, %s3013_s19 }
0x11a5   : > { %p2455_p5 = pnand %p2454_p4, %p3090_p11 }
0x11a6   : > { %p2460_p3 = por %p2459_p1, %p2458_p9 }
0x11a7   : > { %p2456_p7 = pneg %p2455_p5 }
0x11a8   : > { %p2462_p12 = por %p2461_p6, %p2460_p3 }
0x11aa   : > { %p2463_p13 = pnand %p2462_p12, %p2456_p7 }
0x11ac   : > { %2466 = shalt.err (!%p2463_p13)
}
0x11ad   : > { %s2524_s22 = smov 128   ;;  %s2525_s15 = smov 8  }
0x11ae   : > { %2288 = dma.vmem_to_hbm [thread:$0]  (%p3090_p11), %s3015_s27, 256, %s3013_s19, %s1929_s29, %s2524_s22, %s2524_s22, %s2525_s15  }
0x11af PF: > { %s3091_s24 = sld [smem:[#allocation8_spill]]  ;;  %p3092_p8 = scmp.ne.s32.totalorder %s3088_s21, 0 }
0x11b0   : > { %p3093_p10 = scmp.ge.s32.totalorder %s2505_s28, 2 }
0x11b2   : > { %p2295_p0 = pnand %p3093_p10, %p3092_p8 }
0x11b5   : > { %s1957_s18 = sand.u32 1, %s3091_s24  }
0x11b6   : > { %s1958_s23 = scalar_lea.sflag [#allocation4], %s1957_s18 }
0x11b7   : > { %2488 = dma.done.wait (!%p2295_p0), %s1958_s23, 256  }
0x11b8   : > { %2490 = vsyncadd (!%p2295_p0), %s1958_s23, 4294967040  ;;  %s3094_s28 = sld [smem:[#allocation10_spill]]  ;;  %s3095_s14 = sld [smem:[#allocation9_spill]] }
0x11b9   : > { %s3096_s27 = sld [smem:[#allocation11_spill]]  ;;  %s3097_s25 = smov %s2497_s26 }
0x11be   : > { %p26_p2 = scmp.ge.s32.totalorder %s3094_s28, 4   ;;  %s3098_s26 = smov %s3095_s14 }
0x11c0   :  { %28 = sbr.rel (!%p26_p2) target bundleno = 5 (0x5), region = 117 }
0x11c7   :  { %1963 = vsyncpa [#allocation3], 1 }
0x11c8   :  { %1965 = vsyncpa [#allocation3 + $0x1], 1 }
0x11c9   :  { %1966 = vsyncpa [#allocation4], 1 }
0x11ca   :  { %1968 = vsyncpa [#allocation4 + $0x1], 1 }

</bundles_post_ra>
